<compile_context>
chip_gen: v6e
topology: v6e:2x2x1
jax: 0.10.0
libtpu: 0.0.40
codegen_flags: <defaults>
</compile_context>

<pallas_src>
import math

import jax
import jax.numpy as jnp
import numpy as np
from jax.experimental import pallas as pl
from jax.experimental.pallas import tpu as pltpu


# ----------------------------------------------------------------------------- helpers
def _exponents_and_taylor(temp_exponents, t_cols):
    """Replicates the UNIQUAC.__init__ exponent / Taylor-coefficient logic (host side)."""
    te = np.asarray(temp_exponents, dtype=np.float64)
    if t_cols == 1:
        return (1.0,), (1.0,)
    if te.min() < 0 and te.max() == 1:
        tay = 1.0 / np.array([math.factorial(int(abs(x))) for x in (te - 1)], dtype=np.float64)
    elif te.min() == 0 and te.max() > 0:
        tay = 1.0 / np.array([math.factorial(int(abs(x))) for x in te], dtype=np.float64)
    else:
        tay = np.ones_like(te)
    return tuple(float(e) for e in te), tuple(float(t) for t in tay)


def _pick_block(batch, requested):
    if requested is not None:
        if batch % requested != 0:
            raise ValueError(f"batch {batch} not divisible by block_b {requested}")
        return requested
    if batch % 128 != 0:
        return batch  # small / ragged batch: single full-extent block
    tb = 128
    while tb * 2 <= 1024 and batch % (tb * 2) == 0:
        tb *= 2
    return tb


# ----------------------------------------------------------------------------- kernel
def _make_kernel(exps, tayl):
    """Builds the Pallas kernel body with static temperature exponents / Taylor coeffs."""
    exps = tuple(float(e) for e in exps)
    tayl = tuple(float(t) for t in tayl)
    all_int = all(float(e).is_integer() for e in exps)
    int_exps = tuple(int(e) for e in exps) if all_int else None

    def softplus(x):  # matches torch.nn.Softplus(beta=1, threshold=20)
        return jnp.where(x > 20.0, x, jnp.log(1.0 + jnp.exp(jnp.minimum(x, 20.0))))

    def assoc_pair(d_prod, rho_a, rho_d):
        """Wertheim unbonded-site fractions for one component (batch-on-lanes rows)."""
        a = d_prod * rho_a
        d = d_prod * rho_d
        mask_a0 = rho_a == 0.0
        mask_d0 = rho_d == 0.0
        adj_a = jnp.where(mask_a0, 1.0, a)
        adj_d = jnp.where(mask_d0, 1.0, d)
        # Reciprocals computed once and reused (sqrt/..., -1/(2*adj), 1/adj fallback).
        inv_2a = 0.5 / adj_a
        inv_2d = 0.5 / adj_d
        # Guarded rho reciprocals: only used where rho != 0, guard avoids inf/NaN.
        inv_2rho_a = 0.5 / jnp.where(mask_a0, 1.0, rho_a)
        inv_2rho_d = 0.5 / jnp.where(mask_d0, 1.0, rho_d)
        sq_a = jnp.sqrt(adj_a * adj_a - 2.0 * adj_a * (adj_d - 1.0) + (adj_d + 1.0) ** 2)
        sq_d = jnp.sqrt(adj_d * adj_d - 2.0 * adj_d * (adj_a - 1.0) + (adj_a + 1.0) ** 2)
        xa_t = sq_a * inv_2a + 0.5 - rho_d * inv_2rho_a - inv_2a
        xd_t = sq_d * inv_2d + 0.5 - rho_a * inv_2rho_d - inv_2d
        xa = jnp.where(mask_d0, 1.0, jnp.where(mask_a0, 2.0 * inv_2d, xa_t))
        xd = jnp.where(mask_a0, 1.0, jnp.where(mask_d0, 2.0 * inv_2a, xd_t))
        return xa, xd

    def kernel(ij_ref, scal_ref, params_ref, wo_ref, wtt_ref, out_ref):
        # ij_ref:     (2, TB)   int32   rows: i, j
        # scal_ref:   (9, TB)   f32     rows: invT, r, qA, NAa, NAd, rhoAap, rhoAdp, rhoBam, rhoBdm
        # params_ref: (F+2, S)  f32     A^T stacked on D^T (resident every step)
        # wo_ref:     (F, 2)    f32     softmax(O) (hoisted)
        # wtt_ref:    (K, F)    f32     softmax(T)^T (hoisted)
        # out_ref:    (1, TB)   f32     lane-dense result row
        ij = ij_ref[...]
        i_row = ij[0:1, :]
        j_row = ij[1:2, :]
        tb = ij.shape[1]

        params = params_ref[...]                     # (F+2, S)
        n_feat = params.shape[0] - 2
        n_spec = params.shape[1]

        # ---- in-kernel gather: one-hot(i/j) matmul against resident params ----
        s_iota = jax.lax.broadcasted_iota(jnp.int32, (n_spec, tb), 0)
        onehot_i = (s_iota == i_row).astype(jnp.float32)      # (S, TB)
        onehot_j = (s_iota == j_row).astype(jnp.float32)
        gi = jnp.dot(params, onehot_i, preferred_element_type=jnp.float32)  # (F+2, TB)
        gj = jnp.dot(params, onehot_j, preferred_element_type=jnp.float32)
        ai_t = gi[0:n_feat, :]                       # A[i]^T  (F, TB)
        aj_t = gj[0:n_feat, :]                       # A[j]^T
        di_raw = gi[n_feat:n_feat + 2, :]            # D[i]^T  (2, TB)
        dj_raw = gj[n_feat:n_feat + 2, :]

        # ---- OperationSoftmaxWeight (weights precomputed in wrapper) ----
        w_o = wo_ref[...]                            # (F, 2)
        w_o0 = w_o[:, 0:1]                           # "prod" weight (F, 1)
        w_o1 = w_o[:, 1:2]                           # "dif"  weight
        ri = jnp.maximum(ai_t, 0.0)
        rj = jnp.maximum(aj_t, 0.0)
        dif = ai_t - aj_t
        a_comb = ri * rj * w_o0 + dif * dif * w_o1   # (F, TB)
        a_i_comb = ri * ri * w_o0                    # self "dif" term is zero
        a_j_comb = rj * rj * w_o0

        # ---- TempSoftmaxWeight: two fused projections (was three) ----
        w_tt = wtt_ref[...]                          # (K, F)
        dj_dot = jnp.dot(w_tt, a_comb - a_j_comb, preferred_element_type=jnp.float32)  # (K, TB)
        di_dot = jnp.dot(w_tt, a_comb - a_i_comb, preferred_element_type=jnp.float32)

        scal = scal_ref[...]                         # (9, TB)
        inv_temp = scal[0:1, :]
        r_ = scal[1:2, :]
        q_a = scal[2:3, :]
        n_aa = scal[3:4, :]
        n_ad = scal[4:5, :]
        rho_aap = scal[5:6, :]
        rho_adp = scal[6:7, :]
        rho_bam = scal[7:8, :]
        rho_bdm = scal[8:9, :]

        # ---- temperature polynomial via explicit static powers (no pow/exp/log) ----
        if all_int:
            max_pos = max([e for e in int_exps if e > 0], default=0)
            max_neg = max([-e for e in int_exps if e < 0], default=0)
            pos = {}
            cur = None
            for e in range(1, max_pos + 1):
                cur = inv_temp if cur is None else cur * inv_temp
                pos[e] = cur
            neg = {}
            if max_neg > 0:
                temp = 1.0 / inv_temp
                cur = None
                for e in range(1, max_neg + 1):
                    cur = temp if cur is None else cur * temp
                    neg[e] = cur

            def tpow(e):
                e = int(e)
                if e == 0:
                    return None
                return pos[e] if e > 0 else neg[-e]
        else:
            log_inv_temp = jnp.log(inv_temp)

            def tpow(e):
                return None if e == 0.0 else jnp.exp(e * log_inv_temp)

        u_ij = None
        u_ji = None
        for k, e in enumerate(exps):
            cj = dj_dot[k:k + 1, :]
            ci = di_dot[k:k + 1, :]
            if tayl[k] != 1.0:
                cj = cj * tayl[k]
                ci = ci * tayl[k]
            p = tpow(e)
            if p is not None:
                cj = cj * p
                ci = ci * p
            u_ij = cj if u_ij is None else u_ij + cj
            u_ji = ci if u_ji is None else u_ji + ci

        result = q_a * (1.0 + u_ji - jnp.exp(-u_ij))     # (1, TB)

        # ---- Wertheim association term ----
        dref = 0.034 * (jnp.exp(1960.0 * inv_temp) - 1.0)
        d_i = softplus(di_raw)
        d_j = softplus(dj_raw)
        di0, di1 = d_i[0:1, :], d_i[1:2, :]
        dj0, dj1 = d_j[0:1, :], d_j[1:2, :]

        d_aaad = di0 * di1 * dref
        d_babd = dj0 * dj1 * dref
        d_aabd = di0 * dj1 * dref
        d_adba = dj0 * di1 * dref

        xa_bm, xd_bm = assoc_pair(d_babd, rho_bam, rho_bdm)
        xa_ap, xd_ap = assoc_pair(d_aaad, rho_aap, rho_adp)

        # XaAm = 1/(1+yA), XdAm = 1/(1+yD): only needed inside the log -> use -log(1+y).
        y_a = d_aabd * rho_bdm * xd_bm
        y_d = d_adba * rho_bam * xa_bm

        term_aa = jnp.where(
            n_aa == 0.0, 0.0,
            n_aa * (-jnp.log(1.0 + y_a) - jnp.log(xa_ap) + (xa_ap - 1.0) * 0.5))
        term_ad = jnp.where(
            n_ad == 0.0, 0.0,
            n_ad * (-jnp.log(1.0 + y_d) - jnp.log(xd_ap) + (xd_ap - 1.0) * 0.5))
        term_b = r_ * (rho_bam * (1.0 - xa_bm) + rho_bdm * (1.0 - xd_bm)) * 0.5

        out_ref[...] = term_aa + term_ad + term_b + result

    return kernel


# ----------------------------------------------------------------------------- wrapper
def uniquac_forward(A, T, O, D, temp_exponents, i, j, invT, r, qA, qB, N, rho,
                    *, block_b=None):
    """Pallas-backed UNIQUAC forward.  qB is unused (matches the PyTorch module)."""
    del qB
    S, F = A.shape
    K = T.shape[1]
    B = invT.shape[0]

    exps, tayl = _exponents_and_taylor(temp_exponents, K)

    # Parameter-only precompute, hoisted out of the kernel (independent of the batch).
    w_o = jax.nn.softmax(O.astype(jnp.float32), axis=1)          # (F, 2)
    w_tt = jax.nn.softmax(T.astype(jnp.float32), axis=1).T       # (K, F)
    params_t = jnp.concatenate(
        [A.astype(jnp.float32).T, D.astype(jnp.float32).T], axis=0)  # (F+2, S)

    # Pack per-sample inputs: indices (2, B) int32 and scalars (9, B) f32.
    ij = jnp.stack([i, j], axis=0).astype(jnp.int32)             # (2, B)
    scal = jnp.concatenate([
        invT.astype(jnp.float32).reshape(1, B),
        r.astype(jnp.float32).reshape(1, B),
        qA.astype(jnp.float32).reshape(1, B),
        N.astype(jnp.float32).T,
        rho.astype(jnp.float32).T,
    ], axis=0)                                                   # (9, B)

    tb = _pick_block(B, block_b)
    grid = (B // tb,)

    kernel = _make_kernel(exps, tayl)
    out = pl.pallas_call(
        kernel,
        out_shape=jax.ShapeDtypeStruct((1, B), jnp.float32),
        grid_spec=pltpu.PrefetchScalarGridSpec(
            num_scalar_prefetch=0,
            grid=grid,
            in_specs=[
                pl.BlockSpec((2, tb), lambda b: (0, b)),          # ij
                pl.BlockSpec((9, tb), lambda b: (0, b)),          # packed scalars
                pl.BlockSpec((F + 2, S), lambda b: (0, 0)),       # A^T / D^T (resident)
                pl.BlockSpec((F, 2), lambda b: (0, 0)),           # softmax(O)
                pl.BlockSpec((K, F), lambda b: (0, 0)),           # softmax(T)^T
            ],
            out_specs=pl.BlockSpec((1, tb), lambda b: (0, b)),    # lane-dense output
        ),
        compiler_params=pltpu.CompilerParams(
            dimension_semantics=("parallel",),
            vmem_limit_bytes=32 * 1024 * 1024,
        ),
    )(ij, scal, params_t, w_o, w_tt)
    return out.reshape(B, 1)


# ----------------------------------------------------------------------------- reference
def uniquac_reference(A, T, O, D, temp_exponents, i, j, invT, r, qA, qB, N, rho):
    """Pure-JAX faithful translation of the PyTorch UNIQUAC.forward (Wertheim assoc)."""
    del qB
    exps_t, tayl_t = _exponents_and_taylor(temp_exponents, T.shape[1])
    exps = jnp.asarray(exps_t, jnp.float32)[None, :]
    tayl = jnp.asarray(tayl_t, jnp.float32)[None, :]

    relu = lambda x: jnp.maximum(x, 0.0)
    Ai = A[i]
    Aj = A[j]
    wO = jax.nn.softmax(O, axis=1)                               # (F, 2)
    A_combined = relu(Ai) * relu(Aj) * wO[:, 0] + (Ai - Aj) ** 2 * wO[:, 1]
    A_i_comb = relu(Ai) * relu(Ai) * wO[:, 0]
    A_j_comb = relu(Aj) * relu(Aj) * wO[:, 0]
    wT = jax.nn.softmax(T, axis=1)                               # (F, K)
    A_ct = A_combined @ wT
    p_i = A_i_comb @ wT
    p_j = A_j_comb @ wT
    Tmat = jnp.power(invT, exps) * tayl
    u_ij = jnp.sum((A_ct - p_j) * Tmat, axis=1, keepdims=True)
    u_ji = jnp.sum((A_ct - p_i) * Tmat, axis=1, keepdims=True)
    result = qA * (1.0 + u_ji - jnp.exp(-u_ij))

    rf = r.reshape(-1)
    invTf = invT.reshape(-1)
    rhoAap, rhoAdp, rhoBam, rhoBdm = rho[:, 0], rho[:, 1], rho[:, 2], rho[:, 3]
    NAa, NAd = N[:, 0], N[:, 1]
    dref = 0.034 * (jnp.exp(1960.0 * invTf) - 1.0)
    Dsp = jnp.where(D > 20.0, D, jnp.log(1.0 + jnp.exp(jnp.minimum(D, 20.0))))
    D_AaAd = Dsp[i, 0] * Dsp[i, 1] * dref
    D_BaBd = Dsp[j, 0] * Dsp[j, 1] * dref
    D_AaBd = Dsp[i, 0] * Dsp[j, 1] * dref
    D_AdBa = Dsp[j, 0] * Dsp[i, 1] * dref

    bb_a = D_BaBd * rhoBam
    bb_d = D_BaBd * rhoBdm
    m_ba = rhoBam == 0.0
    m_bd = rhoBdm == 0.0
    adj_ba = jnp.where(m_ba, 1.0, bb_a)
    adj_bd = jnp.where(m_bd, 1.0, bb_d)
    XaBm_t = (jnp.sqrt(adj_ba ** 2 - 2 * adj_ba * (adj_bd - 1) + (adj_bd + 1) ** 2) / (2 * adj_ba)
              + 0.5 - rhoBdm / (2 * rhoBam) - 1.0 / (2 * adj_ba))
    XdBm_t = (jnp.sqrt(adj_bd ** 2 - 2 * adj_bd * (adj_ba - 1) + (adj_ba + 1) ** 2) / (2 * adj_bd)
              + 0.5 - rhoBam / (2 * rhoBdm) - 1.0 / (2 * adj_bd))
    XaBm = jnp.where(m_bd, 1.0, jnp.where(m_ba, 1.0 / adj_bd, XaBm_t))
    XdBm = jnp.where(m_ba, 1.0, jnp.where(m_bd, 1.0 / adj_ba, XdBm_t))

    aa_a = D_AaAd * rhoAap
    aa_d = D_AaAd * rhoAdp
    m_aa = rhoAap == 0.0
    m_ad = rhoAdp == 0.0
    adj_aa = jnp.where(m_aa, 1.0, aa_a)
    adj_ad = jnp.where(m_ad, 1.0, aa_d)
    XaAp_t = (jnp.sqrt(adj_aa ** 2 - 2 * adj_aa * (adj_ad - 1) + (adj_ad + 1) ** 2) / (2 * adj_aa)
              + 0.5 - rhoAdp / (2 * rhoAap) - 1.0 / (2 * adj_aa))
    XdAp_t = (jnp.sqrt(adj_ad ** 2 - 2 * adj_ad * (adj_aa - 1) + (adj_aa + 1) ** 2) / (2 * adj_ad)
              + 0.5 - rhoAap / (2 * rhoAdp) - 1.0 / (2 * adj_ad))
    XaAp = jnp.where(m_ad, 1.0, jnp.where(m_aa, 1.0 / adj_ad, XaAp_t))
    XdAp = jnp.where(m_aa, 1.0, jnp.where(m_ad, 1.0 / adj_aa, XdAp_t))

    XaAm = 1.0 / (1.0 + D_AaBd * rhoBdm * XdBm)
    XdAm = 1.0 / (1.0 + D_AdBa * rhoBam * XaBm)
    termAa = jnp.where(NAa == 0.0, 0.0, NAa * (jnp.log(XaAm / XaAp) + (XaAp - 1.0) / 2.0))
    termAd = jnp.where(NAd == 0.0, 0.0, NAd * (jnp.log(XdAm / XdAp) + (XdAp - 1.0) / 2.0))
    termB = rf * (rhoBam * (1.0 - XaBm) / 2.0 + rhoBdm * (1.0 - XdBm) / 2.0)
    combined = termAa + termAd + termB
    return combined[:, None] + result


# ----------------------------------------------------------------------------- demo / test
if __name__ == "__main__":
    key = jax.random.PRNGKey(0)
    B, S, F, K = 256, 16, 32, 4   # batch, num species, hidden features, temp exponents

    ks = jax.random.split(key, 13)
    # Deterministic "parameters" (shapes per the module __init__).
    A = 0.5 * jax.random.normal(ks[0], (S, F), jnp.float32)
    T = 0.5 * jax.random.normal(ks[1], (F, K), jnp.float32)
    O = 0.5 * jax.random.normal(ks[2], (F, 2), jnp.float32)
    D = 0.5 * jax.random.normal(ks[3], (S, 2), jnp.float32)
    temp_exponents = [0, 1, 2, 3]

    # Inputs.
    i = jax.random.randint(ks[4], (B,), 0, S)
    j = jax.random.randint(ks[5], (B,), 0, S)
    Temp = jax.random.uniform(ks[6], (B, 1), jnp.float32, 300.0, 400.0)
    invT = 1.0 / Temp
    r = jax.random.uniform(ks[7], (B, 1), jnp.float32, 0.5, 3.0)
    qA = jax.random.uniform(ks[8], (B, 1), jnp.float32, 0.5, 3.0)
    qB = jax.random.uniform(ks[9], (B, 1), jnp.float32, 0.5, 3.0)  # unused, like torch
    N = jax.random.randint(ks[10], (B, 2), 0, 3).astype(jnp.float32)
    rho_raw = jax.random.uniform(ks[11], (B, 4), jnp.float32, 0.1, 1.0)
    # Keep site densities consistent with site counts (zero sites -> zero density),
    # and sprinkle zeros into the B-component densities to exercise the mask paths.
    rhoA = rho_raw[:, :2] * (N > 0).astype(jnp.float32)
    rhoB = rho_raw[:, 2:] * (jax.random.uniform(ks[12], (B, 2)) > 0.3).astype(jnp.float32)
    rho = jnp.concatenate([rhoA, rhoB], axis=1)

    out = uniquac_forward(A, T, O, D, temp_exponents, i, j, invT, r, qA, qB, N, rho,
                          block_b=128)   # 2-step batch grid, lane-aligned tiles
    out = jax.block_until_ready(out)

    ref = uniquac_reference(A, T, O, D, temp_exponents, i, j, invT, r, qA, qB, N, rho)
    assert out.shape == (B, 1), out.shape
    assert bool(jnp.all(jnp.isfinite(out)))
    np.testing.assert_allclose(np.asarray(out), np.asarray(ref), rtol=1e-2, atol=1e-2)

    print("KERNEL_OK")
</pallas_src>

<mosaic_0001>
module attributes {stable_mosaic.version = 11 : i64} {
  func.func @kernel(%arg0: i32, %arg1: memref<2x128xi32, #tpu.memory_space<vmem>>, %arg2: memref<9x128xf32, #tpu.memory_space<vmem>>, %arg3: memref<34x16xf32, #tpu.memory_space<vmem>>, %arg4: memref<32x2xf32, #tpu.memory_space<vmem>>, %arg5: memref<4x32xf32, #tpu.memory_space<vmem>>, %arg6: memref<1x128xf32, #tpu.memory_space<vmem>>) attributes {dimension_semantics = [#tpu.dimension_semantics<parallel>], iteration_bounds = array<i64: 2>, scalar_prefetch = 0 : i64, scratch_operands = 0 : i64, tpu.core_type = #tpu.core_type<tc>, window_params = [{transform_indices = @transform_0, window_bounds = array<i64: 2, 128>}, {transform_indices = @transform_1, window_bounds = array<i64: 9, 128>}, {pipeline_mode = #tpu.pipeline_mode<synchronous>, transform_indices = @transform_2, window_bounds = array<i64: 34, 16>}, {pipeline_mode = #tpu.pipeline_mode<synchronous>, transform_indices = @transform_3, window_bounds = array<i64: 32, 2>}, {pipeline_mode = #tpu.pipeline_mode<synchronous>, transform_indices = @transform_4, window_bounds = array<i64: 4, 32>}, {transform_indices = @transform_5, window_bounds = array<i64: 1, 128>}]} {
    %c0 = arith.constant 0 : index
    %c0_0 = arith.constant 0 : index
    %0 = vector.load %arg1[%c0, %c0_0] : memref<2x128xi32, #tpu.memory_space<vmem>>, vector<2x128xi32>
    %1 = vector.extract_strided_slice %0 {offsets = [0, 0], sizes = [1, 128], strides = [1, 1]} : vector<2x128xi32> to vector<1x128xi32>
    %2 = vector.extract_strided_slice %0 {offsets = [1, 0], sizes = [1, 128], strides = [1, 1]} : vector<2x128xi32> to vector<1x128xi32>
    %c0_1 = arith.constant 0 : index
    %c0_2 = arith.constant 0 : index
    %3 = vector.load %arg3[%c0_1, %c0_2] : memref<34x16xf32, #tpu.memory_space<vmem>>, vector<34x16xf32>
    %4 = tpu.iota {dimensions = array<i32: 0>} : vector<16x128xi32>
    %5 = vector.broadcast %1 : vector<1x128xi32> to vector<16x128xi32>
    %6 = arith.cmpi eq, %4, %5 : vector<16x128xi32>
    %7 = arith.extui %6 : vector<16x128xi1> to vector<16x128xi32>
    %8 = arith.sitofp %7 : vector<16x128xi32> to vector<16x128xf32>
    %9 = vector.broadcast %2 : vector<1x128xi32> to vector<16x128xi32>
    %10 = arith.cmpi eq, %4, %9 : vector<16x128xi32>
    %11 = arith.extui %10 : vector<16x128xi1> to vector<16x128xi32>
    %12 = arith.sitofp %11 : vector<16x128xi32> to vector<16x128xf32>
    %cst = arith.constant dense<0.000000e+00> : vector<34x128xf32>
    %13 = tpu.matmul %3, %8, %cst {dimension_numbers = #tpu.dot_dimension_numbers<[1], [0], [0], [1], [0, 0, 1, 1], [], []>} : vector<34x16xf32>, vector<16x128xf32>, vector<34x128xf32> -> vector<34x128xf32>
    %cst_3 = arith.constant dense<0.000000e+00> : vector<34x128xf32>
    %14 = tpu.matmul %3, %12, %cst_3 {dimension_numbers = #tpu.dot_dimension_numbers<[1], [0], [0], [1], [0, 0, 1, 1], [], []>} : vector<34x16xf32>, vector<16x128xf32>, vector<34x128xf32> -> vector<34x128xf32>
    %15 = vector.extract_strided_slice %13 {offsets = [0, 0], sizes = [32, 128], strides = [1, 1]} : vector<34x128xf32> to vector<32x128xf32>
    %16 = vector.extract_strided_slice %14 {offsets = [0, 0], sizes = [32, 128], strides = [1, 1]} : vector<34x128xf32> to vector<32x128xf32>
    %17 = vector.extract_strided_slice %13 {offsets = [32, 0], sizes = [2, 128], strides = [1, 1]} : vector<34x128xf32> to vector<2x128xf32>
    %18 = vector.extract_strided_slice %14 {offsets = [32, 0], sizes = [2, 128], strides = [1, 1]} : vector<34x128xf32> to vector<2x128xf32>
    %c0_4 = arith.constant 0 : index
    %c0_5 = arith.constant 0 : index
    %19 = vector.load %arg4[%c0_4, %c0_5] : memref<32x2xf32, #tpu.memory_space<vmem>>, vector<32x2xf32>
    %20 = vector.extract_strided_slice %19 {offsets = [0, 0], sizes = [32, 1], strides = [1, 1]} : vector<32x2xf32> to vector<32x1xf32>
    %21 = vector.extract_strided_slice %19 {offsets = [0, 1], sizes = [32, 1], strides = [1, 1]} : vector<32x2xf32> to vector<32x1xf32>
    %cst_6 = arith.constant 0.000000e+00 : f32
    %22 = vector.broadcast %cst_6 : f32 to vector<32x128xf32>
    %23 = arith.maximumf %15, %22 : vector<32x128xf32>
    %cst_7 = arith.constant 0.000000e+00 : f32
    %24 = vector.broadcast %cst_7 : f32 to vector<32x128xf32>
    %25 = arith.maximumf %16, %24 : vector<32x128xf32>
    %26 = arith.subf %15, %16 : vector<32x128xf32>
    %27 = arith.mulf %23, %25 : vector<32x128xf32>
    %28 = vector.broadcast %20 : vector<32x1xf32> to vector<32x128xf32>
    %29 = arith.mulf %27, %28 : vector<32x128xf32>
    %30 = arith.mulf %26, %26 : vector<32x128xf32>
    %31 = vector.broadcast %21 : vector<32x1xf32> to vector<32x128xf32>
    %32 = arith.mulf %30, %31 : vector<32x128xf32>
    %33 = arith.addf %29, %32 : vector<32x128xf32>
    %34 = arith.mulf %23, %23 : vector<32x128xf32>
    %35 = vector.broadcast %20 : vector<32x1xf32> to vector<32x128xf32>
    %36 = arith.mulf %34, %35 : vector<32x128xf32>
    %37 = arith.mulf %25, %25 : vector<32x128xf32>
    %38 = vector.broadcast %20 : vector<32x1xf32> to vector<32x128xf32>
    %39 = arith.mulf %37, %38 : vector<32x128xf32>
    %c0_8 = arith.constant 0 : index
    %c0_9 = arith.constant 0 : index
    %40 = vector.load %arg5[%c0_8, %c0_9] : memref<4x32xf32, #tpu.memory_space<vmem>>, vector<4x32xf32>
    %41 = arith.subf %33, %39 : vector<32x128xf32>
    %cst_10 = arith.constant dense<0.000000e+00> : vector<4x128xf32>
    %42 = tpu.matmul %40, %41, %cst_10 {dimension_numbers = #tpu.dot_dimension_numbers<[1], [0], [0], [1], [0, 0, 1, 1], [], []>} : vector<4x32xf32>, vector<32x128xf32>, vector<4x128xf32> -> vector<4x128xf32>
    %43 = arith.subf %33, %36 : vector<32x128xf32>
    %cst_11 = arith.constant dense<0.000000e+00> : vector<4x128xf32>
    %44 = tpu.matmul %40, %43, %cst_11 {dimension_numbers = #tpu.dot_dimension_numbers<[1], [0], [0], [1], [0, 0, 1, 1], [], []>} : vector<4x32xf32>, vector<32x128xf32>, vector<4x128xf32> -> vector<4x128xf32>
    %c0_12 = arith.constant 0 : index
    %c0_13 = arith.constant 0 : index
    %45 = vector.load %arg2[%c0_12, %c0_13] : memref<9x128xf32, #tpu.memory_space<vmem>>, vector<9x128xf32>
    %46 = vector.extract_strided_slice %45 {offsets = [0, 0], sizes = [1, 128], strides = [1, 1]} : vector<9x128xf32> to vector<1x128xf32>
    %47 = vector.extract_strided_slice %45 {offsets = [1, 0], sizes = [1, 128], strides = [1, 1]} : vector<9x128xf32> to vector<1x128xf32>
    %48 = vector.extract_strided_slice %45 {offsets = [2, 0], sizes = [1, 128], strides = [1, 1]} : vector<9x128xf32> to vector<1x128xf32>
    %49 = vector.extract_strided_slice %45 {offsets = [3, 0], sizes = [1, 128], strides = [1, 1]} : vector<9x128xf32> to vector<1x128xf32>
    %50 = vector.extract_strided_slice %45 {offsets = [4, 0], sizes = [1, 128], strides = [1, 1]} : vector<9x128xf32> to vector<1x128xf32>
    %51 = vector.extract_strided_slice %45 {offsets = [5, 0], sizes = [1, 128], strides = [1, 1]} : vector<9x128xf32> to vector<1x128xf32>
    %52 = vector.extract_strided_slice %45 {offsets = [6, 0], sizes = [1, 128], strides = [1, 1]} : vector<9x128xf32> to vector<1x128xf32>
    %53 = vector.extract_strided_slice %45 {offsets = [7, 0], sizes = [1, 128], strides = [1, 1]} : vector<9x128xf32> to vector<1x128xf32>
    %54 = vector.extract_strided_slice %45 {offsets = [8, 0], sizes = [1, 128], strides = [1, 1]} : vector<9x128xf32> to vector<1x128xf32>
    %55 = arith.mulf %46, %46 : vector<1x128xf32>
    %56 = arith.mulf %55, %46 : vector<1x128xf32>
    %57 = vector.extract_strided_slice %42 {offsets = [0, 0], sizes = [1, 128], strides = [1, 1]} : vector<4x128xf32> to vector<1x128xf32>
    %58 = vector.extract_strided_slice %44 {offsets = [0, 0], sizes = [1, 128], strides = [1, 1]} : vector<4x128xf32> to vector<1x128xf32>
    %59 = vector.extract_strided_slice %42 {offsets = [1, 0], sizes = [1, 128], strides = [1, 1]} : vector<4x128xf32> to vector<1x128xf32>
    %60 = vector.extract_strided_slice %44 {offsets = [1, 0], sizes = [1, 128], strides = [1, 1]} : vector<4x128xf32> to vector<1x128xf32>
    %61 = arith.mulf %59, %46 : vector<1x128xf32>
    %62 = arith.mulf %60, %46 : vector<1x128xf32>
    %63 = arith.addf %57, %61 : vector<1x128xf32>
    %64 = arith.addf %58, %62 : vector<1x128xf32>
    %65 = vector.extract_strided_slice %42 {offsets = [2, 0], sizes = [1, 128], strides = [1, 1]} : vector<4x128xf32> to vector<1x128xf32>
    %66 = vector.extract_strided_slice %44 {offsets = [2, 0], sizes = [1, 128], strides = [1, 1]} : vector<4x128xf32> to vector<1x128xf32>
    %cst_14 = arith.constant 5.000000e-01 : f32
    %67 = vector.broadcast %cst_14 : f32 to vector<1x128xf32>
    %68 = arith.mulf %65, %67 : vector<1x128xf32>
    %cst_15 = arith.constant 5.000000e-01 : f32
    %69 = vector.broadcast %cst_15 : f32 to vector<1x128xf32>
    %70 = arith.mulf %66, %69 : vector<1x128xf32>
    %71 = arith.mulf %68, %55 : vector<1x128xf32>
    %72 = arith.mulf %70, %55 : vector<1x128xf32>
    %73 = arith.addf %63, %71 : vector<1x128xf32>
    %74 = arith.addf %64, %72 : vector<1x128xf32>
    %75 = vector.extract_strided_slice %42 {offsets = [3, 0], sizes = [1, 128], strides = [1, 1]} : vector<4x128xf32> to vector<1x128xf32>
    %76 = vector.extract_strided_slice %44 {offsets = [3, 0], sizes = [1, 128], strides = [1, 1]} : vector<4x128xf32> to vector<1x128xf32>
    %cst_16 = arith.constant 0.166666672 : f32
    %77 = vector.broadcast %cst_16 : f32 to vector<1x128xf32>
    %78 = arith.mulf %75, %77 : vector<1x128xf32>
    %cst_17 = arith.constant 0.166666672 : f32
    %79 = vector.broadcast %cst_17 : f32 to vector<1x128xf32>
    %80 = arith.mulf %76, %79 : vector<1x128xf32>
    %81 = arith.mulf %78, %56 : vector<1x128xf32>
    %82 = arith.mulf %80, %56 : vector<1x128xf32>
    %83 = arith.addf %73, %81 : vector<1x128xf32>
    %84 = arith.addf %74, %82 : vector<1x128xf32>
    %cst_18 = arith.constant 1.000000e+00 : f32
    %85 = vector.broadcast %cst_18 : f32 to vector<1x128xf32>
    %86 = arith.addf %85, %84 : vector<1x128xf32>
    %cst_19 = arith.constant 0.000000e+00 : f32
    %87 = vector.broadcast %cst_19 : f32 to vector<1x128xf32>
    %88 = arith.subf %87, %83 : vector<1x128xf32>
    %89 = math.exp %88 : vector<1x128xf32>
    %90 = arith.subf %86, %89 : vector<1x128xf32>
    %91 = arith.mulf %48, %90 : vector<1x128xf32>
    %cst_20 = arith.constant 1.960000e+03 : f32
    %92 = vector.broadcast %cst_20 : f32 to vector<1x128xf32>
    %93 = arith.mulf %92, %46 : vector<1x128xf32>
    %94 = math.exp %93 : vector<1x128xf32>
    %cst_21 = arith.constant 1.000000e+00 : f32
    %95 = vector.broadcast %cst_21 : f32 to vector<1x128xf32>
    %96 = arith.subf %94, %95 : vector<1x128xf32>
    %cst_22 = arith.constant 3.400000e-02 : f32
    %97 = vector.broadcast %cst_22 : f32 to vector<1x128xf32>
    %98 = arith.mulf %97, %96 : vector<1x128xf32>
    %cst_23 = arith.constant 2.000000e+01 : f32
    %99 = vector.broadcast %cst_23 : f32 to vector<2x128xf32>
    %100 = arith.cmpf ogt, %17, %99 : vector<2x128xf32>
    %cst_24 = arith.constant 2.000000e+01 : f32
    %101 = vector.broadcast %cst_24 : f32 to vector<2x128xf32>
    %102 = arith.minimumf %17, %101 : vector<2x128xf32>
    %103 = math.exp %102 : vector<2x128xf32>
    %cst_25 = arith.constant 1.000000e+00 : f32
    %104 = vector.broadcast %cst_25 : f32 to vector<2x128xf32>
    %105 = arith.addf %104, %103 : vector<2x128xf32>
    %106 = math.log %105 : vector<2x128xf32>
    %107 = arith.select %100, %17, %106 : vector<2x128xi1>, vector<2x128xf32>
    %cst_26 = arith.constant 2.000000e+01 : f32
    %108 = vector.broadcast %cst_26 : f32 to vector<2x128xf32>
    %109 = arith.cmpf ogt, %18, %108 : vector<2x128xf32>
    %cst_27 = arith.constant 2.000000e+01 : f32
    %110 = vector.broadcast %cst_27 : f32 to vector<2x128xf32>
    %111 = arith.minimumf %18, %110 : vector<2x128xf32>
    %112 = math.exp %111 : vector<2x128xf32>
    %cst_28 = arith.constant 1.000000e+00 : f32
    %113 = vector.broadcast %cst_28 : f32 to vector<2x128xf32>
    %114 = arith.addf %113, %112 : vector<2x128xf32>
    %115 = math.log %114 : vector<2x128xf32>
    %116 = arith.select %109, %18, %115 : vector<2x128xi1>, vector<2x128xf32>
    %117 = vector.extract_strided_slice %107 {offsets = [0, 0], sizes = [1, 128], strides = [1, 1]} : vector<2x128xf32> to vector<1x128xf32>
    %118 = vector.extract_strided_slice %107 {offsets = [1, 0], sizes = [1, 128], strides = [1, 1]} : vector<2x128xf32> to vector<1x128xf32>
    %119 = vector.extract_strided_slice %116 {offsets = [0, 0], sizes = [1, 128], strides = [1, 1]} : vector<2x128xf32> to vector<1x128xf32>
    %120 = vector.extract_strided_slice %116 {offsets = [1, 0], sizes = [1, 128], strides = [1, 1]} : vector<2x128xf32> to vector<1x128xf32>
    %121 = arith.mulf %117, %118 : vector<1x128xf32>
    %122 = arith.mulf %121, %98 : vector<1x128xf32>
    %123 = arith.mulf %119, %120 : vector<1x128xf32>
    %124 = arith.mulf %123, %98 : vector<1x128xf32>
    %125 = arith.mulf %117, %120 : vector<1x128xf32>
    %126 = arith.mulf %125, %98 : vector<1x128xf32>
    %127 = arith.mulf %119, %118 : vector<1x128xf32>
    %128 = arith.mulf %127, %98 : vector<1x128xf32>
    %129 = arith.mulf %124, %53 : vector<1x128xf32>
    %130 = arith.mulf %124, %54 : vector<1x128xf32>
    %cst_29 = arith.constant 0.000000e+00 : f32
    %131 = vector.broadcast %cst_29 : f32 to vector<1x128xf32>
    %132 = arith.cmpf oeq, %53, %131 : vector<1x128xf32>
    %cst_30 = arith.constant 0.000000e+00 : f32
    %133 = vector.broadcast %cst_30 : f32 to vector<1x128xf32>
    %134 = arith.cmpf oeq, %54, %133 : vector<1x128xf32>
    %cst_31 = arith.constant 1.000000e+00 : f32
    %135 = vector.broadcast %cst_31 : f32 to vector<1x128xf32>
    %136 = arith.select %132, %135, %129 : vector<1x128xi1>, vector<1x128xf32>
    %cst_32 = arith.constant 1.000000e+00 : f32
    %137 = vector.broadcast %cst_32 : f32 to vector<1x128xf32>
    %138 = arith.select %134, %137, %130 : vector<1x128xi1>, vector<1x128xf32>
    %cst_33 = arith.constant 5.000000e-01 : f32
    %139 = vector.broadcast %cst_33 : f32 to vector<1x128xf32>
    %140 = arith.divf %139, %136 : vector<1x128xf32>
    %cst_34 = arith.constant 5.000000e-01 : f32
    %141 = vector.broadcast %cst_34 : f32 to vector<1x128xf32>
    %142 = arith.divf %141, %138 : vector<1x128xf32>
    %cst_35 = arith.constant 1.000000e+00 : f32
    %143 = vector.broadcast %cst_35 : f32 to vector<1x128xf32>
    %144 = arith.select %132, %143, %53 : vector<1x128xi1>, vector<1x128xf32>
    %cst_36 = arith.constant 5.000000e-01 : f32
    %145 = vector.broadcast %cst_36 : f32 to vector<1x128xf32>
    %146 = arith.divf %145, %144 : vector<1x128xf32>
    %cst_37 = arith.constant 1.000000e+00 : f32
    %147 = vector.broadcast %cst_37 : f32 to vector<1x128xf32>
    %148 = arith.select %134, %147, %54 : vector<1x128xi1>, vector<1x128xf32>
    %cst_38 = arith.constant 5.000000e-01 : f32
    %149 = vector.broadcast %cst_38 : f32 to vector<1x128xf32>
    %150 = arith.divf %149, %148 : vector<1x128xf32>
    %151 = arith.mulf %136, %136 : vector<1x128xf32>
    %cst_39 = arith.constant 2.000000e+00 : f32
    %152 = vector.broadcast %cst_39 : f32 to vector<1x128xf32>
    %153 = arith.mulf %152, %136 : vector<1x128xf32>
    %cst_40 = arith.constant 1.000000e+00 : f32
    %154 = vector.broadcast %cst_40 : f32 to vector<1x128xf32>
    %155 = arith.subf %138, %154 : vector<1x128xf32>
    %156 = arith.mulf %153, %155 : vector<1x128xf32>
    %157 = arith.subf %151, %156 : vector<1x128xf32>
    %cst_41 = arith.constant 1.000000e+00 : f32
    %158 = vector.broadcast %cst_41 : f32 to vector<1x128xf32>
    %159 = arith.addf %138, %158 : vector<1x128xf32>
    %160 = arith.mulf %159, %159 : vector<1x128xf32>
    %161 = arith.addf %157, %160 : vector<1x128xf32>
    %162 = math.sqrt %161 : vector<1x128xf32>
    %163 = arith.mulf %138, %138 : vector<1x128xf32>
    %cst_42 = arith.constant 2.000000e+00 : f32
    %164 = vector.broadcast %cst_42 : f32 to vector<1x128xf32>
    %165 = arith.mulf %164, %138 : vector<1x128xf32>
    %cst_43 = arith.constant 1.000000e+00 : f32
    %166 = vector.broadcast %cst_43 : f32 to vector<1x128xf32>
    %167 = arith.subf %136, %166 : vector<1x128xf32>
    %168 = arith.mulf %165, %167 : vector<1x128xf32>
    %169 = arith.subf %163, %168 : vector<1x128xf32>
    %cst_44 = arith.constant 1.000000e+00 : f32
    %170 = vector.broadcast %cst_44 : f32 to vector<1x128xf32>
    %171 = arith.addf %136, %170 : vector<1x128xf32>
    %172 = arith.mulf %171, %171 : vector<1x128xf32>
    %173 = arith.addf %169, %172 : vector<1x128xf32>
    %174 = math.sqrt %173 : vector<1x128xf32>
    %175 = arith.mulf %162, %140 : vector<1x128xf32>
    %cst_45 = arith.constant 5.000000e-01 : f32
    %176 = vector.broadcast %cst_45 : f32 to vector<1x128xf32>
    %177 = arith.addf %175, %176 : vector<1x128xf32>
    %178 = arith.mulf %54, %146 : vector<1x128xf32>
    %179 = arith.subf %177, %178 : vector<1x128xf32>
    %180 = arith.subf %179, %140 : vector<1x128xf32>
    %181 = arith.mulf %174, %142 : vector<1x128xf32>
    %cst_46 = arith.constant 5.000000e-01 : f32
    %182 = vector.broadcast %cst_46 : f32 to vector<1x128xf32>
    %183 = arith.addf %181, %182 : vector<1x128xf32>
    %184 = arith.mulf %53, %150 : vector<1x128xf32>
    %185 = arith.subf %183, %184 : vector<1x128xf32>
    %186 = arith.subf %185, %142 : vector<1x128xf32>
    %cst_47 = arith.constant 2.000000e+00 : f32
    %187 = vector.broadcast %cst_47 : f32 to vector<1x128xf32>
    %188 = arith.mulf %187, %142 : vector<1x128xf32>
    %189 = arith.select %132, %188, %180 : vector<1x128xi1>, vector<1x128xf32>
    %cst_48 = arith.constant 1.000000e+00 : f32
    %190 = vector.broadcast %cst_48 : f32 to vector<1x128xf32>
    %191 = arith.select %134, %190, %189 : vector<1x128xi1>, vector<1x128xf32>
    %cst_49 = arith.constant 2.000000e+00 : f32
    %192 = vector.broadcast %cst_49 : f32 to vector<1x128xf32>
    %193 = arith.mulf %192, %140 : vector<1x128xf32>
    %194 = arith.select %134, %193, %186 : vector<1x128xi1>, vector<1x128xf32>
    %cst_50 = arith.constant 1.000000e+00 : f32
    %195 = vector.broadcast %cst_50 : f32 to vector<1x128xf32>
    %196 = arith.select %132, %195, %194 : vector<1x128xi1>, vector<1x128xf32>
    %197 = arith.mulf %122, %51 : vector<1x128xf32>
    %198 = arith.mulf %122, %52 : vector<1x128xf32>
    %cst_51 = arith.constant 0.000000e+00 : f32
    %199 = vector.broadcast %cst_51 : f32 to vector<1x128xf32>
    %200 = arith.cmpf oeq, %51, %199 : vector<1x128xf32>
    %cst_52 = arith.constant 0.000000e+00 : f32
    %201 = vector.broadcast %cst_52 : f32 to vector<1x128xf32>
    %202 = arith.cmpf oeq, %52, %201 : vector<1x128xf32>
    %cst_53 = arith.constant 1.000000e+00 : f32
    %203 = vector.broadcast %cst_53 : f32 to vector<1x128xf32>
    %204 = arith.select %200, %203, %197 : vector<1x128xi1>, vector<1x128xf32>
    %cst_54 = arith.constant 1.000000e+00 : f32
    %205 = vector.broadcast %cst_54 : f32 to vector<1x128xf32>
    %206 = arith.select %202, %205, %198 : vector<1x128xi1>, vector<1x128xf32>
    %cst_55 = arith.constant 5.000000e-01 : f32
    %207 = vector.broadcast %cst_55 : f32 to vector<1x128xf32>
    %208 = arith.divf %207, %204 : vector<1x128xf32>
    %cst_56 = arith.constant 5.000000e-01 : f32
    %209 = vector.broadcast %cst_56 : f32 to vector<1x128xf32>
    %210 = arith.divf %209, %206 : vector<1x128xf32>
    %cst_57 = arith.constant 1.000000e+00 : f32
    %211 = vector.broadcast %cst_57 : f32 to vector<1x128xf32>
    %212 = arith.select %200, %211, %51 : vector<1x128xi1>, vector<1x128xf32>
    %cst_58 = arith.constant 5.000000e-01 : f32
    %213 = vector.broadcast %cst_58 : f32 to vector<1x128xf32>
    %214 = arith.divf %213, %212 : vector<1x128xf32>
    %cst_59 = arith.constant 1.000000e+00 : f32
    %215 = vector.broadcast %cst_59 : f32 to vector<1x128xf32>
    %216 = arith.select %202, %215, %52 : vector<1x128xi1>, vector<1x128xf32>
    %cst_60 = arith.constant 5.000000e-01 : f32
    %217 = vector.broadcast %cst_60 : f32 to vector<1x128xf32>
    %218 = arith.divf %217, %216 : vector<1x128xf32>
    %219 = arith.mulf %204, %204 : vector<1x128xf32>
    %cst_61 = arith.constant 2.000000e+00 : f32
    %220 = vector.broadcast %cst_61 : f32 to vector<1x128xf32>
    %221 = arith.mulf %220, %204 : vector<1x128xf32>
    %cst_62 = arith.constant 1.000000e+00 : f32
    %222 = vector.broadcast %cst_62 : f32 to vector<1x128xf32>
    %223 = arith.subf %206, %222 : vector<1x128xf32>
    %224 = arith.mulf %221, %223 : vector<1x128xf32>
    %225 = arith.subf %219, %224 : vector<1x128xf32>
    %cst_63 = arith.constant 1.000000e+00 : f32
    %226 = vector.broadcast %cst_63 : f32 to vector<1x128xf32>
    %227 = arith.addf %206, %226 : vector<1x128xf32>
    %228 = arith.mulf %227, %227 : vector<1x128xf32>
    %229 = arith.addf %225, %228 : vector<1x128xf32>
    %230 = math.sqrt %229 : vector<1x128xf32>
    %231 = arith.mulf %206, %206 : vector<1x128xf32>
    %cst_64 = arith.constant 2.000000e+00 : f32
    %232 = vector.broadcast %cst_64 : f32 to vector<1x128xf32>
    %233 = arith.mulf %232, %206 : vector<1x128xf32>
    %cst_65 = arith.constant 1.000000e+00 : f32
    %234 = vector.broadcast %cst_65 : f32 to vector<1x128xf32>
    %235 = arith.subf %204, %234 : vector<1x128xf32>
    %236 = arith.mulf %233, %235 : vector<1x128xf32>
    %237 = arith.subf %231, %236 : vector<1x128xf32>
    %cst_66 = arith.constant 1.000000e+00 : f32
    %238 = vector.broadcast %cst_66 : f32 to vector<1x128xf32>
    %239 = arith.addf %204, %238 : vector<1x128xf32>
    %240 = arith.mulf %239, %239 : vector<1x128xf32>
    %241 = arith.addf %237, %240 : vector<1x128xf32>
    %242 = math.sqrt %241 : vector<1x128xf32>
    %243 = arith.mulf %230, %208 : vector<1x128xf32>
    %cst_67 = arith.constant 5.000000e-01 : f32
    %244 = vector.broadcast %cst_67 : f32 to vector<1x128xf32>
    %245 = arith.addf %243, %244 : vector<1x128xf32>
    %246 = arith.mulf %52, %214 : vector<1x128xf32>
    %247 = arith.subf %245, %246 : vector<1x128xf32>
    %248 = arith.subf %247, %208 : vector<1x128xf32>
    %249 = arith.mulf %242, %210 : vector<1x128xf32>
    %cst_68 = arith.constant 5.000000e-01 : f32
    %250 = vector.broadcast %cst_68 : f32 to vector<1x128xf32>
    %251 = arith.addf %249, %250 : vector<1x128xf32>
    %252 = arith.mulf %51, %218 : vector<1x128xf32>
    %253 = arith.subf %251, %252 : vector<1x128xf32>
    %254 = arith.subf %253, %210 : vector<1x128xf32>
    %cst_69 = arith.constant 2.000000e+00 : f32
    %255 = vector.broadcast %cst_69 : f32 to vector<1x128xf32>
    %256 = arith.mulf %255, %210 : vector<1x128xf32>
    %257 = arith.select %200, %256, %248 : vector<1x128xi1>, vector<1x128xf32>
    %cst_70 = arith.constant 1.000000e+00 : f32
    %258 = vector.broadcast %cst_70 : f32 to vector<1x128xf32>
    %259 = arith.select %202, %258, %257 : vector<1x128xi1>, vector<1x128xf32>
    %cst_71 = arith.constant 2.000000e+00 : f32
    %260 = vector.broadcast %cst_71 : f32 to vector<1x128xf32>
    %261 = arith.mulf %260, %208 : vector<1x128xf32>
    %262 = arith.select %202, %261, %254 : vector<1x128xi1>, vector<1x128xf32>
    %cst_72 = arith.constant 1.000000e+00 : f32
    %263 = vector.broadcast %cst_72 : f32 to vector<1x128xf32>
    %264 = arith.select %200, %263, %262 : vector<1x128xi1>, vector<1x128xf32>
    %265 = arith.mulf %126, %54 : vector<1x128xf32>
    %266 = arith.mulf %265, %196 : vector<1x128xf32>
    %267 = arith.mulf %128, %53 : vector<1x128xf32>
    %268 = arith.mulf %267, %191 : vector<1x128xf32>
    %cst_73 = arith.constant 0.000000e+00 : f32
    %269 = vector.broadcast %cst_73 : f32 to vector<1x128xf32>
    %270 = arith.cmpf oeq, %49, %269 : vector<1x128xf32>
    %cst_74 = arith.constant 1.000000e+00 : f32
    %271 = vector.broadcast %cst_74 : f32 to vector<1x128xf32>
    %272 = arith.addf %271, %266 : vector<1x128xf32>
    %273 = math.log %272 : vector<1x128xf32>
    %cst_75 = arith.constant 0.000000e+00 : f32
    %274 = vector.broadcast %cst_75 : f32 to vector<1x128xf32>
    %275 = arith.subf %274, %273 : vector<1x128xf32>
    %276 = math.log %259 : vector<1x128xf32>
    %277 = arith.subf %275, %276 : vector<1x128xf32>
    %cst_76 = arith.constant 1.000000e+00 : f32
    %278 = vector.broadcast %cst_76 : f32 to vector<1x128xf32>
    %279 = arith.subf %259, %278 : vector<1x128xf32>
    %cst_77 = arith.constant 5.000000e-01 : f32
    %280 = vector.broadcast %cst_77 : f32 to vector<1x128xf32>
    %281 = arith.mulf %279, %280 : vector<1x128xf32>
    %282 = arith.addf %277, %281 : vector<1x128xf32>
    %283 = arith.mulf %49, %282 : vector<1x128xf32>
    %cst_78 = arith.constant 0.000000e+00 : f32
    %284 = vector.broadcast %cst_78 : f32 to vector<1x128xf32>
    %285 = arith.select %270, %284, %283 : vector<1x128xi1>, vector<1x128xf32>
    %cst_79 = arith.constant 0.000000e+00 : f32
    %286 = vector.broadcast %cst_79 : f32 to vector<1x128xf32>
    %287 = arith.cmpf oeq, %50, %286 : vector<1x128xf32>
    %cst_80 = arith.constant 1.000000e+00 : f32
    %288 = vector.broadcast %cst_80 : f32 to vector<1x128xf32>
    %289 = arith.addf %288, %268 : vector<1x128xf32>
    %290 = math.log %289 : vector<1x128xf32>
    %cst_81 = arith.constant 0.000000e+00 : f32
    %291 = vector.broadcast %cst_81 : f32 to vector<1x128xf32>
    %292 = arith.subf %291, %290 : vector<1x128xf32>
    %293 = math.log %264 : vector<1x128xf32>
    %294 = arith.subf %292, %293 : vector<1x128xf32>
    %cst_82 = arith.constant 1.000000e+00 : f32
    %295 = vector.broadcast %cst_82 : f32 to vector<1x128xf32>
    %296 = arith.subf %264, %295 : vector<1x128xf32>
    %cst_83 = arith.constant 5.000000e-01 : f32
    %297 = vector.broadcast %cst_83 : f32 to vector<1x128xf32>
    %298 = arith.mulf %296, %297 : vector<1x128xf32>
    %299 = arith.addf %294, %298 : vector<1x128xf32>
    %300 = arith.mulf %50, %299 : vector<1x128xf32>
    %cst_84 = arith.constant 0.000000e+00 : f32
    %301 = vector.broadcast %cst_84 : f32 to vector<1x128xf32>
    %302 = arith.select %287, %301, %300 : vector<1x128xi1>, vector<1x128xf32>
    %cst_85 = arith.constant 1.000000e+00 : f32
    %303 = vector.broadcast %cst_85 : f32 to vector<1x128xf32>
    %304 = arith.subf %303, %191 : vector<1x128xf32>
    %305 = arith.mulf %53, %304 : vector<1x128xf32>
    %cst_86 = arith.constant 1.000000e+00 : f32
    %306 = vector.broadcast %cst_86 : f32 to vector<1x128xf32>
    %307 = arith.subf %306, %196 : vector<1x128xf32>
    %308 = arith.mulf %54, %307 : vector<1x128xf32>
    %309 = arith.addf %305, %308 : vector<1x128xf32>
    %310 = arith.mulf %47, %309 : vector<1x128xf32>
    %cst_87 = arith.constant 5.000000e-01 : f32
    %311 = vector.broadcast %cst_87 : f32 to vector<1x128xf32>
    %312 = arith.mulf %310, %311 : vector<1x128xf32>
    %313 = arith.addf %285, %302 : vector<1x128xf32>
    %314 = arith.addf %313, %312 : vector<1x128xf32>
    %315 = arith.addf %314, %91 : vector<1x128xf32>
    %c0_88 = arith.constant 0 : index
    %c0_89 = arith.constant 0 : index
    %316 = vector.load %arg6[%c0_88, %c0_89] : memref<1x128xf32, #tpu.memory_space<vmem>>, vector<1x128xf32>
    tpu.vector_store %arg6[%c0_88, %c0_89], %315 {strides = array<i32>} : memref<1x128xf32, #tpu.memory_space<vmem>>, vector<1x128xf32>,
    return
  }
  func.func @transform_0(%arg0: i32) -> (i32, i32) {
    %c0_i32 = arith.constant 0 : i32
    %c0_i32_0 = arith.constant 0 : i32
    return %c0_i32, %arg0 : i32, i32
  }
  func.func @transform_1(%arg0: i32) -> (i32, i32) {
    %c0_i32 = arith.constant 0 : i32
    %c0_i32_0 = arith.constant 0 : i32
    return %c0_i32, %arg0 : i32, i32
  }
  func.func @transform_2(%arg0: i32) -> (i32, i32) {
    %c0_i32 = arith.constant 0 : i32
    %c0_i32_0 = arith.constant 0 : i32
    %c0_i32_1 = arith.constant 0 : i32
    return %c0_i32, %c0_i32_0 : i32, i32
  }
  func.func @transform_3(%arg0: i32) -> (i32, i32) {
    %c0_i32 = arith.constant 0 : i32
    %c0_i32_0 = arith.constant 0 : i32
    %c0_i32_1 = arith.constant 0 : i32
    return %c0_i32, %c0_i32_0 : i32, i32
  }
  func.func @transform_4(%arg0: i32) -> (i32, i32) {
    %c0_i32 = arith.constant 0 : i32
    %c0_i32_0 = arith.constant 0 : i32
    %c0_i32_1 = arith.constant 0 : i32
    return %c0_i32, %c0_i32_0 : i32, i32
  }
  func.func @transform_5(%arg0: i32) -> (i32, i32) {
    %c0_i32 = arith.constant 0 : i32
    %c0_i32_0 = arith.constant 0 : i32
    return %c0_i32, %arg0 : i32, i32
  }
}

</mosaic_0001>

<bundles_post_ra>
// kernel: tpu_custom_call.1
= control target key start
LH: loop header
LB: loop body
LE: loop exit
PB: predicated region body
PF: predicated region fallthrough
CT: control target
= control target key end

     0   :  { %10 = vsyncpa [#allocation4], 0  ;;  %s1800_s0 = inlined_call_operand.vmem [shape: s32[2,256], index: 0, kind: input, shape index: {}]   ;;  %s1801_s1 = inlined_call_operand.vmem [shape: f32[9,256], index: 1, kind: input, shape index: {}]   ;;  %s1802_s2 = inlined_call_operand.vmem [shape: f32[34,16], index: 2, kind: input, shape index: {}]   ;;  %s1803_s3 = inlined_call_operand.vmem [shape: f32[32,2], index: 3, kind: input, shape index: {}]   ;;  %s1804_s4 = inlined_call_operand.vmem [shape: f32[4,32], index: 4, kind: input, shape index: {}]   ;;  %s1805_s5 = inlined_call_operand.hbm [shape: f32[1,256], index: 5, kind: output, shape index: {}]  }
   0x1   :  { %12 = vsyncpa [#allocation4 + $0x1], 0  ;;  %s1508_s18 = smov 0   ;;  %s1510_s19 = smov 0  }
   0x2   :  { %s1512_s20 = smov 0   ;;  %s1514_s21 = smov 0  }
   0x3 LB: > { %s1529_s22 = sadd.s32 4294967295, %s1470_s21   ;;  %s1199_s23 = sadd.s32 4294967294, %s1470_s21   ;;  %s1470_s21 = sphi %s1514_s21, %s1813_s21   ;;  %s1466_s20 = sphi %s1512_s20, %s1812_s20   ;;  %s1462_s19 = sphi %s1510_s19, %s1811_s19   ;;  %s1458_s18 = sphi %s1508_s18, %s1810_s18  }
   0x4   : > { %s1533_s24 = sadd.s32 1, %s1470_s21   ;;  %s51_s25 = sadd.s32 1, %s1466_s20 }
   0x5   : > { %s48_s26 = ssub.s32 %s1470_s21, %s1533_s24  ;;  %p58_p0 = scmp.ne.s32.totalorder %s1466_s20, %s1462_s19 }
   0x6   : > { %p49_p1 = scmp.eq.s32.totalorder %s48_s26, 0  ;;  %p59_p2 = scmp.eq.s32.totalorder %s1470_s21, 0 }
   0x7   : > { %p151_p3 = scmp.eq.s32.totalorder %s1529_s22, 1  ;;  %p156_p4 = scmp.ne.s32.totalorder %s1462_s19, %s1458_s18 }
   0x8   : > { %s1545_s27 = scalar_select %p49_p1, %s1466_s20, %s51_s25  }
   0x9   : > { %p60_p5 = por %p59_p2, %p58_p0  ;;  %p1547_p6 = por %p151_p3, %p58_p0 }
   0xa   : > { %p157_p7 = scmp.eq.s32.totalorder %s1199_s23, 1  ;;  %p1806_p9 = scmp.ge.s32.totalorder %s1470_s21, 2 }
   0xc   : > { %p1551_p8 = por %p157_p7, %p156_p4  ;;  %182 = sbr.rel (%p1806_p9) target bundleno = 22 (0x16), region = 28 }
  0x11   : > { %192 = sbr.rel (!%p60_p5) target bundleno = 22 (0x16), region = 36  ;;  %s194_s30 = sand.u32 (%p60_p5), 1, %s1466_s20  }
  0x12   : > { %s1203_s6 = sshll.u32 (%p60_p5), %s1470_s21, 3  ;;  %s1202_s7 = sshll.u32 (%p60_p5), %s194_s30, 4 }
  0x13   : > { %s198_s10 = scalar_lea.vmem (%p60_p5), %s1801_s1, %s1203_s6  ;;  %s196_s11 = scalar_lea.vmem (%p60_p5), [#allocation2], %s1202_s7 }
  0x14   : > { %v229_v0 = vld [vmem:[%s198_s10] sm:$0xff] (%p60_p5)  ;;  %v231_v1 = vld [vmem:[%s198_s10 + $0x10] sm:$0xff] (%p60_p5) }
  0x15   : > { %230 = vst [vmem:[%s196_s11] sm:$0xff] (%p60_p5), %v229_v0  ;;  %232 = vst [vmem:[%s196_s11 + $0x8] sm:$0xff] (%p60_p5), %v231_v1 }
  0x16 PF: > { %p1204_p10 = scmp.ge.s32.totalorder %s1470_s21, 1  ;;  %p237_p11 = scmp.lt.s32.totalorder %s1470_s21, 3 }
  0x18   : > { %p238_p12 = pnand %p1204_p10, %p237_p11 }
  0x19   : > { %p274_p13 = scmp.lt.s32.totalorder (!%p238_p12), %s1529_s22, 1  ;;  %s1644_s25 = sand.u32 (!%p238_p12), 1, %s1462_s19  }
  0x1a   : > { %241 = sbr.rel (%p238_p12) target bundleno = 510 (0x1fe), region = 74  ;;  %s1234_s8 = sshll.u32 (!%p238_p12), %s1529_s22, 4 }
  0x1b   : > { %s273_s9 = scalar_lea.vmem (!%p238_p12), [#allocation3], %s1644_s25  ;;  %s1124_s13 = scalar_lea.hbm (!%p238_p12), %s1805_s5, %s1234_s8 }
  0x1c   : > { %s1126_s10 = sshll.u32 (!%p238_p12), %s273_s9, 4  ;;  %s1477_s16 = smov (!%p238_p12), [#allocation3]   ;;  %s1127_s10 = int_to_ptr.vmem [resolvable:$true] %s1126_s10 }
  0x1d   : > { %s1410_s15 = scalar_lea.vmem (!%p238_p12), %s1127_s10, 16 }
  0x1e   : > { %p1411_p0 = scmp.ne.s32.totalorder (!%p238_p12), %s1127_s10, %s1410_s15 }
  0x1f   : > { %v284_v2 = vlaneseq  ;;  %v1472_v3 = vmov 0.0   ;;  %v505_v4 = vld [vmem:[%s1803_s3 + $0x10] sm:$0xff]  ;;  %s275_s14 = scalar_select %p274_p13, %s1529_s22, 1  ;;  %vm1473_vm0 = vmmov 0   ;;  %v506_v6 = vld [vmem:[%s1803_s3 + $0x18] sm:$0xff]  ;;  %v1474_v7 = vmov 0  }
  0x20   : > { %1261 = vmatprep.subr.mxu0 %v1472_v3  ;;  %1280 = vmatprep.subr.mxu1 %v1472_v3  ;;  %v1475_v14 = vmov 1   ;;  %v1476_v15 = vmov 1.0   ;;  %v279_v16 = vld [vmem:[%s1802_s2] sm:$0xff]  ;;  %vm307_vm5 = vcmask 130048   ;;  %v504_v17 = vld [vmem:[%s1803_s3 + $0x8] sm:$0xff]  ;;  %v281_v20 = vld [vmem:[%s1802_s2 + $0x10] sm:$0xff]  ;;  %p1412_p1 = pnand %p1411_p0, %p1547_p6 }
  0x21   : > { %v285_v5 = vshrl.u32 %v284_v2, 7  ;;  %1265 = vmatprep.mubr.msk.f32.mxu0 %vm1473_vm0, %v1472_v3  ;;  %1284 = vmatprep.mubr.msk.f32.mxu1 %vm1473_vm0, %v1472_v3  ;;  %s1206_s17 = sshll.u32 %s275_s14, 1  ;;  %v280_v18 = vld [vmem:[%s1802_s2 + $0x8] sm:$0xff]  ;;  %v503_v19 = vld [vmem:[%s1803_s3] sm:$0xff]  ;;  %v282_v21 = vld [vmem:[%s1802_s2 + $0x18] sm:$0xff]  ;;  %vm596_vm6 = vcmask 261120  }
  0x22   : > { %1367 = vset.pattern.permute.xlu1 %v1474_v7  ;;  %1365 = vset.pattern.permute.xlu0 %v1474_v7  ;;  %s277_s26 = scalar_lea.vmem %s1800_s0, %s1206_s17  ;;  %v283_v22 = vld [vmem:[%s1802_s2 + $0x20] sm:$0x3]  ;;  %s1114_s14 = scalar_lea.sflag [#allocation4], %s1644_s25 }
  0x23   : > { %v289_v8 = vsub.s32 0, %v285_v5  ;;  %v299_v9 = vsub.s32 1, %v285_v5  ;;  %535 = vperm.xlu1 %1367, %v505_v4   ;;  %540 = vperm.xlu0 %1365, %v506_v6   ;;  %v286_v10 = vadd.s32 8, %v285_v5  ;;  %v278_v11 = vld [vmem:[%s277_s26] sm:$0x3]  ;;  %s1205_s26 = sshll.u32 %s1644_s25, 4  ;;  %p1413_p2 = pneg %p1412_p1 }
  0x24   : > { %s1661_s30 = scalar_lea.vmem [#allocation2], %s1205_s26  ;;  %s1414_s17 = sshll.u32 %s1477_s16, 4  ;;  %s1415_s17 = int_to_ptr.vmem [resolvable:$false] %s1414_s17 }
  0x25   : > { %v290_v12 = vrot.slane %v278_v11, %v289_v8  ;;  %v300_v13 = vrot.slane %v278_v11, %v299_v9  ;;  %s1416_s22 = scalar_lea.vmem %s1415_s17, 32  ;;  %p1417_p3 = scmp.lt.s32.totalorder %s1127_s10, %s1415_s17 }
  0x26   : > { %p1418_p4 = scmp.lt.s32.totalorder %s1416_s22, %s1410_s15 }
  0x27   : > { %1368 = vset.pattern.permute.xlu1 %v1475_v14  ;;  %1366 = vset.pattern.permute.xlu0 %v1475_v14  ;;  %vm292_vm1 = vcmp.eq.s32.totalorder %v286_v10, %v290_v12  ;;  %vm302_vm2 = vcmp.eq.s32.totalorder %v286_v10, %v300_v13  ;;  %vm291_vm3 = vcmp.eq.s32.totalorder %v285_v5, %v290_v12 }
  0x28   : > { %vm301_vm4 = vcmp.eq.s32.totalorder %v285_v5, %v300_v13  ;;  %560 = vperm.xlu1 %1368, %v505_v4   ;;  %1262 = vmatpush3.msk.msra.mxu0 %vm292_vm1, %v1476_v15  ;;  %p1419_p5 = por %p1418_p4, %p1417_p3 }
  0x29   : > { %1281 = vmatpush3.msk.msra.mxu1 %vm302_vm2, %v1476_v15  ;;  %1263 = vmatprep.subr.mxu0 %v1472_v3 }
  0x2a   : > { %1282 = vmatprep.subr.mxu1 %v1472_v3  ;;  %1264 = vmatpush3.msk.msra.mxu0 %vm291_vm3, %v1476_v15  ;;  %p1420_p7 = pnand %p1419_p5, %p1413_p2 }
  0x2b   : > { %1283 = vmatpush3.msk.msra.mxu1 %vm301_vm4, %v1476_v15  ;;  %1266 = vmatmul.mubr.msk.f32.vlgmr.msra.gmra.mxu0 %vm307_vm5, %v279_v16 }
  0x2c   : > { %1285 = vmatmul.mubr.msk.f32.vlgmr.msra.gmra.mxu1 %vm307_vm5, %v279_v16  ;;  %1268 = vmatprep.mubr.msk.f32.mxu0 %vm1473_vm0, %v1472_v3 }
  0x2d   : > { %1287 = vmatprep.mubr.msk.f32.mxu1 %vm1473_vm0, %v1472_v3  ;;  %564 = vperm.xlu0 %1366, %v506_v6  }
  0x2e   : > { %1369 = vset.pattern.permute.xlu1 %v1474_v7  ;;  %1299 = vmatprep.subr.mxu0 %v1472_v3 }
  0x2f   : > { %530 = vperm.xlu1 %1369, %v504_v17   ;;  %1269 = vmatmul.mubr.msk.f32.gmra.mxu0 %vm307_vm5, %v280_v18 }
  0x30   : > { %1288 = vmatmul.mubr.msk.f32.gmra.mxu1 %vm307_vm5, %v280_v18  ;;  %1271 = vmatprep.mubr.msk.f32.mxu0 %vm1473_vm0, %v1472_v3 }
  0x31   : > { %1290 = vmatprep.mubr.msk.f32.mxu1 %vm1473_vm0, %v1472_v3  ;;  %556 = vperm.xlu0 %1366, %v504_v17  }
  0x32   : > { %1310 = vmatprep.subr.mxu1 %v1472_v3 }
  0x33   : > { %525 = vperm.xlu1 %1369, %v503_v19   ;;  %1272 = vmatmul.mubr.msk.f32.gmra.mxu0 %vm307_vm5, %v281_v20 }
  0x34   : > { %1291 = vmatmul.mubr.msk.f32.gmra.mxu1 %vm307_vm5, %v281_v20  ;;  %1274 = vmatprep.mubr.msk.f32.mxu0 %vm1473_vm0, %v1472_v3 }
  0x35   : > { %1293 = vmatprep.mubr.msk.f32.mxu1 %vm1473_vm0, %v1472_v3  ;;  %552 = vperm.xlu0 %1366, %v503_v19  }
  0x37   : > { %1275 = vmatmul.mubr.msk.f32.gmra.mxu0 %vm307_vm5, %v282_v21 }
  0x38   : > { %1294 = vmatmul.mubr.msk.f32.gmra.mxu1 %vm307_vm5, %v282_v21  ;;  %1277 = vmatprep.mubr.msk.f32.mxu0 %vm1473_vm0, %v1472_v3 }
  0x39   : > { %1296 = vmatprep.mubr.msk.f32.mxu1 %vm1473_vm0, %v1472_v3 }
  0x3b   : > { %1278 = vmatmul.mubr.msk.f32.gmra.mxu0 %vm307_vm5, %v283_v22 }
  0x3c   : > { %1297 = vmatmul.mubr.msk.f32.gmra.mxu1 %vm307_vm5, %v283_v22  ;;  %1307 = vmatprep.mubr.msk.f32.mxu0 %vm1473_vm0, %v1472_v3 }
  0x3d   : > { %1318 = vmatprep.mubr.msk.f32.mxu1 %vm1473_vm0, %v1472_v3 }
  0x9e   : > { %v1637_v23 = vpop.permute.xlu0 %540  ;;  %v1639_v24 = vpop.permute.xlu1 %535 }
  0xa3   : > { %v561_v28 = vpop.permute.xlu1 %560 }
  0xa8   : > { %v565_v25 = vpop.permute.xlu0 %564 }
  0xaa   : > { %v1641_v36 = vpop.permute.xlu1 %530 }
  0xac   : > { %v557_v33 = vpop.permute.xlu0 %556 }
  0xae   : > { %v526_v55 = vpop.permute.xlu1 %525 }
  0xb0   : > { %v553_v50 = vpop.permute.xlu0 %552 }
  0xeb   : > { %v389_v26 = vpop.f32.mrf.mxu0 }
  0xec   : > { %v479_v27 = vpop.f32.mrf.mxu1  ;;  %v507_v38 = vmax.f32 %v389_v26, 0.0 }
  0xed   : > { %v1267_v29 = vpop.f32.mrf.mxu0  ;;  %v515_v37 = vsub.f32 %v389_v26, %v479_v27  ;;  %v511_v39 = vmax.f32 %v479_v27, 0.0 }
  0xee   : > { %v1286_v30 = vpop.f32.mrf.mxu1  ;;  %v575_v2 = vmul.f32 %v507_v38, %v507_v38 }
  0xef   : > { %v394_v31 = vpop.f32.mrf.mxu0  ;;  %v547_v49 = vmul.f32 %v515_v37, %v515_v37  ;;  %v519_v56 = vmul.f32 %v511_v39, %v507_v38 }
  0xf0   : > { %v484_v32 = vpop.f32.mrf.mxu1  ;;  %v508_v40 = vmax.f32 %v394_v31, 0.0 }
  0xf1   : > { %v1270_v34 = vpop.f32.mrf.mxu0  ;;  %v512_v43 = vmax.f32 %v484_v32, 0.0  ;;  %v516_v44 = vsub.f32 %v394_v31, %v484_v32  ;;  %v567_v1 = vmul.f32 %v553_v50, %v547_v49  ;;  %v543_v12 = vmul.f32 %v526_v55, %v519_v56  ;;  %v591_v50 = vld [vmem:[%s1804_s4] sm:$0xf] }
  0xf2   : > { %v1289_v35 = vpop.f32.mrf.mxu1  ;;  %v576_v22 = vmul.f32 %v508_v40, %v508_v40 }
  0xf3   : > { %v399_v41 = vpop.f32.mrf.mxu0  ;;  %v520_v57 = vmul.f32 %v512_v43, %v508_v40  ;;  %v548_v58 = vmul.f32 %v516_v44, %v516_v44  ;;  %v584_v26 = vmul.f32 %v512_v43, %v512_v43  ;;  %v1664_v43 = vld [vmem:[%s1661_s30] sm:$0xff] }
  0xf4   : > { %v489_v42 = vpop.f32.mrf.mxu1  ;;  %v509_v45 = vmax.f32 %v399_v41, 0.0  ;;  %vm837_vm9 = vcmp.eq.f32.partialorder %v1664_v43, 0.0 }
  0xf5   : > { %v513_v46 = vmax.f32 %v489_v42, 0.0  ;;  %v1273_v47 = vpop.f32.mrf.mxu0  ;;  %v517_v51 = vsub.f32 %v399_v41, %v489_v42  ;;  %v544_v13 = vmul.f32 %v1641_v36, %v520_v57  ;;  %v568_v14 = vmul.f32 %v557_v33, %v548_v58 }
  0xf6   : > { %v1292_v48 = vpop.f32.mrf.mxu1  ;;  %v577_v16 = vmul.f32 %v509_v45, %v509_v45  ;;  %v583_v33 = vmul.f32 %v511_v39, %v511_v39  ;;  %v571_v41 = vadd.f32 %v567_v1, %v543_v12  ;;  %v580_v42 = vmul.f32 %v576_v22, %v1641_v36 }
  0xf7   : > { %v521_v52 = vmul.f32 %v513_v46, %v509_v45  ;;  %v404_v53 = vpop.f32.mrf.mxu0  ;;  %v549_v59 = vmul.f32 %v517_v51, %v517_v51  ;;  %v585_v17 = vmul.f32 %v513_v46, %v513_v46  ;;  %v572_v34 = vadd.f32 %v568_v14, %v544_v13 }
  0xf8   : > { %v494_v54 = vpop.f32.mrf.mxu1  ;;  %v510_v60 = vmax.f32 %v404_v53, 0.0  ;;  %v581_v37 = vmul.f32 %v577_v16, %v1639_v24  ;;  %v579_v45 = vmul.f32 %v575_v2, %v526_v55  ;;  %v800_v48 = vmul.f32 1960.0, %v1664_v43 }
  0xf9   : > { %v514_v61 = vmax.f32 %v494_v54, 0.0  ;;  %v518_v62 = vsub.f32 %v404_v53, %v494_v54  ;;  %v1276_v63 = vpop.f32.mrf.mxu0  ;;  %v545_v4 = vmul.f32 %v1639_v24, %v521_v52  ;;  %v569_v5 = vmul.f32 %v561_v28, %v549_v59 }
  0xfa   : > { %v1295_v0 = vpop.f32.mrf.mxu1  ;;  %v578_v6 = vmul.f32 %v510_v60, %v510_v60  ;;  %v671_v47 = vsub.f32 %v572_v34, %v580_v42  ;;  %v670_v49 = vsub.f32 %v571_v41, %v579_v45  ;;  %v801_v51 = vmul.f32 1.442695, %v800_v48  ;;  %v1681_v63 = vld [vmem:[%s1661_s30 + $0x8] sm:$0x1] }
  0xfb   : > { %v522_v7 = vmul.f32 %v514_v61, %v510_v60  ;;  %v550_v8 = vmul.f32 %v518_v62, %v518_v62  ;;  %v586_v9 = vmul.f32 %v514_v61, %v514_v61  ;;  %v1649_v11 = vpop.f32.mrf.mxu0  ;;  %v573_v29 = vadd.f32 %v569_v5, %v545_v4 }
  0xfc   : > { %v1647_v10 = vpop.f32.mrf.mxu1  ;;  %v806_v28 = vmin.f32 %v1649_v11, 20.0  ;;  %v582_v30 = vmul.f32 %v578_v6, %v1637_v23  ;;  %vm805_vm8 = vcmp.gt.f32.partialorder %v1649_v11, 20.0  ;;  %v1687_v2 = vrot.slane %v1664_v43, 7 }
  0xfd   : > { %v814_v15 = vmin.f32 %v1647_v10, 20.0  ;;  %v546_v18 = vmul.f32 %v1637_v23, %v522_v7  ;;  %v570_v19 = vmul.f32 %v565_v25, %v550_v8  ;;  %v1279_v21 = vpop.f32.mrf.mxu0  ;;  %v590_v32 = vmul.f32 %v586_v9, %v1637_v23 }
  0xfe   : > { %v1298_v20 = vpop.f32.mrf.mxu1  ;;  %v807_v35 = vmul.f32 1.442695, %v806_v28  ;;  %v589_v25 = vmul.f32 %v585_v17, %v1639_v24  ;;  %v588_v23 = vmul.f32 %v584_v26, %v1641_v36  ;;  %v672_v44 = vsub.f32 %v573_v29, %v581_v37 }
  0xff   : > { %v815_v27 = vmul.f32 1.442695, %v814_v15  ;;  %v574_v31 = vadd.f32 %v570_v19, %v546_v18  ;;  %v587_v24 = vmul.f32 %v583_v33, %v526_v55  ;;  %vm813_vm7 = vcmp.gt.f32.partialorder %v1647_v10, 20.0 }
 0x100   : > { %v594_v39 = vsub.f32 %v573_v29, %v589_v25  ;;  %v593_v46 = vsub.f32 %v572_v34, %v588_v23  ;;  %vm838_vm10 = vcmp.eq.f32.partialorder %v1681_v63, 0.0  ;;  %v848_v7 = vsel %vm837_vm9, 1.0, %v1664_v43 }
 0x101   : > { %1370 = vpow2.f32 %v815_v27  ;;  %v595_v38 = vsub.f32 %v574_v31, %v590_v32  ;;  %v673_v40 = vsub.f32 %v574_v31, %v582_v30  ;;  %v592_v36 = vsub.f32 %v571_v41, %v587_v24 }
 0x102   : > { %1372 = vpow2.f32 %v807_v35  ;;  %v936_v8 = vrot.slane %v1664_v43, 5  ;;  %v939_v9 = vrot.slane %v1664_v43, 6  ;;  %v851_v13 = vsel %vm838_vm10, 1.0, %v1681_v63 }
 0x103   : > { %1300 = vmatpush3.msra.mxu0 %v595_v38  ;;  %1311 = vmatpush3.msra.mxu1 %v673_v40  ;;  %1374 = vpow2.f32 %v801_v51 }
 0x104   : > { %1301 = vmatprep.subr.mxu0 %v1472_v3  ;;  %1312 = vmatprep.subr.mxu1 %v1472_v3 }
 0x105   : > { %1302 = vmatpush3.msra.mxu0 %v594_v39  ;;  %1313 = vmatpush3.msra.mxu1 %v672_v44 }
 0x106   : > { %1303 = vmatprep.subr.mxu0 %v1472_v3  ;;  %1314 = vmatprep.subr.mxu1 %v1472_v3 }
 0x107   : > { %1304 = vmatpush3.msra.mxu0 %v593_v46  ;;  %1315 = vmatpush3.msra.mxu1 %v671_v47 }
 0x108   : > { %1305 = vmatprep.subr.mxu0 %v1472_v3  ;;  %1316 = vmatprep.subr.mxu1 %v1472_v3 }
 0x109   : > { %1306 = vmatpush3.msra.mxu0 %v592_v36  ;;  %1317 = vmatpush3.msra.mxu1 %v670_v49 }
 0x10a   : > { %1308 = vmatmul.mubr.msk.f32.vlgmr.msra.gmra.mxu0 %vm596_vm6, %v591_v50  ;;  %1319 = vmatmul.mubr.msk.f32.vlgmr.msra.gmra.mxu1 %vm596_vm6, %v591_v50 }
 0x10e   : > { %v1371_v52 = vpop.eup %1370 }
 0x10f   : > { %v817_v53 = vadd.f32 1.0, %v1371_v52  ;;  %v1373_v54 = vpop.eup %1372 }
 0x110   : > { %v809_v55 = vadd.f32 1.0, %v1373_v54  ;;  %v1375_v56 = vpop.eup %1374 }
 0x111   : > { %1376 = vlog2.f32 %v817_v53  ;;  %v1227_v58 = vadd.f32 -1.0, %v1375_v56 }
 0x112   : > { %1378 = vlog2.f32 %v809_v55 }
 0x113   : > { %v1683_v0 = vmul.f32 0.034, %v1227_v58  ;;  %1380 = vrcp.f32 %v848_v7 }
 0x114   : > { %1382 = vrcp.f32 %v851_v13 }
 0x11e   : > { %v1377_v57 = vpop.eup %1376 }
 0x11f   : > { %v819_v59 = vmul.f32 0.6931472, %v1377_v57  ;;  %v1379_v3 = vpop.eup %1378 }
 0x120   : > { %v811_v61 = vmul.f32 0.6931472, %v1379_v3  ;;  %v1381_v53 = vpop.eup %1380 }
 0x121   : > { %v820_v60 = vsel %vm813_vm7, %v1647_v10, %v819_v59  ;;  %v1383_v56 = vpop.eup %1382 }
 0x122   : > { %v827_v62 = vrot.slane %v820_v60, 1  ;;  %v812_v1 = vsel %vm805_vm8, %v1649_v11, %v811_v61 }
 0x123   : > { %v822_v5 = vrot.slane %v812_v1, 1 }
 0x124   : > { %v829_v4 = vmul.f32 %v827_v62, %v820_v60  ;;  %v1689_v6 = vmul.f32 %v827_v62, %v812_v1 }
 0x125   : > { %v824_v10 = vmul.f32 %v822_v5, %v812_v1  ;;  %v1698_v11 = vmul.f32 %v822_v5, %v820_v60  ;;  %v853_v5 = vmul.f32 0.5, %v1383_v56 }
 0x126   : > { %v830_v12 = vmul.f32 %v829_v4, %v1683_v0  ;;  %v850_v4 = vmul.f32 0.5, %v1381_v53 }
 0x127   : > { %v825_v14 = vmul.f32 %v824_v10, %v1683_v0  ;;  %v910_v13 = vrot.slane %v853_v5, 1 }
 0x128   : > { %v835_v15 = vmul.f32 %v830_v12, %v1687_v2  ;;  %v836_v16 = vmul.f32 %v830_v12, %v1681_v63  ;;  %v899_v12 = vrot.slane %v850_v4, 7 }
 0x129   : > { %v938_v19 = vmul.f32 %v936_v8, %v825_v14  ;;  %v941_v20 = vmul.f32 %v939_v9, %v825_v14 }
 0x12a   : > { %v840_v17 = vrot.slane %v835_v15, 1  ;;  %v843_v18 = vsel %vm838_vm10, 1.0, %v836_v16 }
 0x12b   : > { %v1228_v21 = vadd.f32 -1.0, %v843_v18  ;;  %v862_v22 = vadd.f32 1.0, %v843_v18  ;;  %v943_v27 = vrot.slane %v938_v19, 3  ;;  %v947_v28 = vrot.slane %v941_v20, 2 }
 0x12c   : > { %v842_v26 = vsel %vm837_vm9, 1.0, %v840_v17  ;;  %v876_v33 = vmul.f32 2.0, %v843_v18  ;;  %v875_v25 = vmul.f32 %v843_v18, %v843_v18  ;;  %1384 = vrcp.f32 %v843_v18 }
 0x12d   : > { %v854_v29 = vmul.f32 %v842_v26, %v842_v26  ;;  %v855_v30 = vmul.f32 2.0, %v842_v26  ;;  %v858_v31 = vrot.slane %v1228_v21, 1  ;;  %v863_v32 = vmul.f32 %v862_v22, %v862_v22 }
 0x12e   : > { %v1229_v34 = vadd.f32 -1.0, %v842_v26  ;;  %v883_v35 = vadd.f32 1.0, %v842_v26  ;;  %v949_v38 = vsel %vm837_vm9, 1.0, %v947_v28  ;;  %v945_v23 = vsel %vm837_vm9, 1.0, %v943_v27 }
 0x12f   : > { %v860_v37 = vmul.f32 %v858_v31, %v855_v30  ;;  %v865_v40 = vrot.slane %v863_v32, 1  ;;  %v1230_v44 = vadd.f32 -1.0, %v949_v38  ;;  %v962_v45 = vadd.f32 1.0, %v949_v38 }
 0x130   : > { %v879_v41 = vrot.slane %v1229_v34, 7  ;;  %v884_v42 = vmul.f32 %v883_v35, %v883_v35  ;;  %1386 = vrcp.f32 %v842_v26  ;;  %v955_v47 = vmul.f32 2.0, %v945_v23 }
 0x131   : > { %v861_v39 = vsub.f32 %v854_v29, %v860_v37  ;;  %v958_v36 = vrot.slane %v1230_v44, 1  ;;  %v963_v49 = vmul.f32 %v962_v45, %v962_v45  ;;  %v1231_v50 = vadd.f32 -1.0, %v945_v23 }
 0x132   : > { %v881_v24 = vmul.f32 %v879_v41, %v876_v33  ;;  %v886_v46 = vrot.slane %v884_v42, 7  ;;  %v983_v52 = vadd.f32 1.0, %v945_v23  ;;  %v954_v54 = vmul.f32 %v945_v23, %v945_v23 }
 0x133   : > { %v867_v48 = vadd.f32 %v865_v40, %v861_v39  ;;  %v976_v55 = vmul.f32 2.0, %v949_v38  ;;  %v960_v58 = vmul.f32 %v958_v36, %v955_v47  ;;  %v979_v59 = vrot.slane %v1231_v50, 7 }
 0x134   : > { %v882_v51 = vsub.f32 %v875_v25, %v881_v24  ;;  %v965_v3 = vrot.slane %v963_v49, 1  ;;  %v975_v60 = vmul.f32 %v949_v38, %v949_v38  ;;  %v984_v61 = vmul.f32 %v983_v52, %v983_v52 }
 0x135   : > { %1388 = vrsqrt.f32 %v867_v48  ;;  %v961_v62 = vsub.f32 %v954_v54, %v960_v58  ;;  %v981_v1 = vmul.f32 %v979_v59, %v976_v55  ;;  %vm870_vm11 = vcmp.eq.f32.partialorder %v867_v48, inf }
 0x136   : > { %v888_v57 = vadd.f32 %v886_v46, %v882_v51  ;;  %v986_v9 = vrot.slane %v984_v61, 7  ;;  %v873_v17 = vand.u32 2147483648, %v867_v48  ;;  %v901_v18 = vmul.f32 %v899_v12, %v1681_v63 }
 0x137   : > { %v967_v7 = vadd.f32 %v965_v3, %v961_v62  ;;  %v982_v8 = vsub.f32 %v975_v60, %v981_v1  ;;  %v912_v19 = vmul.f32 %v910_v13, %v1664_v43  ;;  %vm872_vm12 = vcmp.eq.f32.partialorder %v867_v48, 0.0 }
 0x138   : > { %1390 = vrsqrt.f32 %v888_v57  ;;  %vm891_vm13 = vcmp.eq.f32.partialorder %v888_v57, inf  ;;  %v894_v28 = vand.u32 2147483648, %v888_v57  ;;  %vm893_vm14 = vcmp.eq.f32.partialorder %v888_v57, 0.0 }
 0x139   : > { %1392 = vrcp.f32 %v945_v23  ;;  %v1385_v10 = vpop.eup %1384  ;;  %v1715_v15 = vadd.f32 %v986_v9, %v982_v8  ;;  %v903_v34 = vrot.slane %v901_v18, 1  ;;  %v914_v35 = vrot.slane %v912_v19, 7 }
 0x13a   : > { %1394 = vrcp.f32 %v949_v38  ;;  %v847_v21 = vmul.f32 0.5, %v1385_v10  ;;  %v834_v25 = vmul.f32 %v1698_v11, %v1683_v0  ;;  %v998_v40 = vmul.f32 %v899_v12, %v1664_v43 }
 0x13b   : > { %1396 = vrsqrt.f32 %v967_v7  ;;  %v1006_v41 = vrot.slane %v850_v4, 1  ;;  %vm970_vm15 = vcmp.eq.f32.partialorder %v967_v7, inf  ;;  %v973_v47 = vand.u32 2147483648, %v967_v7 }
 0x13c   : > { %1398 = vrsqrt.f32 %v1715_v15  ;;  %v918_v29 = vmul.f32 2.0, %v847_v21  ;;  %vm972_vm0 = vcmp.eq.f32.partialorder %v967_v7, 0.0  ;;  %v1000_v51 = vrot.slane %v998_v40, 1 }
 0x13d   : > { %v1387_v14 = vpop.eup %1386  ;;  %v1008_v11 = vmul.f32 %v1006_v41, %v1664_v43  ;;  %v1037_v52 = vmul.f32 %v834_v25, %v1687_v2  ;;  %vm991_vm1 = vcmp.eq.f32.partialorder %v1715_v15, inf  ;;  %v994_v3 = vand.u32 2147483648, %v1715_v15 }
 0x13e   : > { %v845_v20 = vmul.f32 0.5, %v1387_v14  ;;  %v920_v39 = vrot.slane %v918_v29, 1  ;;  %vm993_vm2 = vcmp.eq.f32.partialorder %v1715_v15, 0.0  ;;  %v832_v1 = vmul.f32 %v1689_v6, %v1683_v0 }
 0x13f   : > { %v1010_v9 = vrot.slane %v1008_v11, 7 }
 0x140   : > { %v927_v44 = vmul.f32 2.0, %v845_v20  ;;  %v1032_v0 = vmul.f32 %v832_v1, %v1681_v63 }
 0x142   : > { %v1389_v16 = vpop.eup %1388  ;;  %v929_v54 = vrot.slane %v927_v44, 7 }
 0x143   : > { %v869_v22 = vmul.f32 %v1389_v16, %v867_v48 }
 0x145   : > { %v1391_v26 = vpop.eup %1390  ;;  %v871_v27 = vsel %vm870_vm11, %v867_v48, %v869_v22 }
 0x146   : > { %v874_v30 = vsel %vm872_vm12, %v873_v17, %v871_v27  ;;  %v890_v31 = vmul.f32 %v1391_v26, %v888_v57  ;;  %v1393_v32 = vpop.eup %1392 }
 0x147   : > { %v896_v33 = vmul.f32 %v874_v30, %v845_v20  ;;  %v1395_v37 = vpop.eup %1394  ;;  %v951_v46 = vmul.f32 0.5, %v1393_v32 }
 0x148   : > { %v892_v38 = vsel %vm891_vm13, %v888_v57, %v890_v31  ;;  %v1397_v45 = vpop.eup %1396  ;;  %v953_v36 = vmul.f32 0.5, %v1395_v37 }
 0x149   : > { %v895_v42 = vsel %vm893_vm14, %v894_v28, %v892_v38  ;;  %v897_v23 = vadd.f32 0.5, %v896_v33  ;;  %v969_v49 = vmul.f32 %v1397_v45, %v967_v7  ;;  %v1399_v57 = vpop.eup %1398  ;;  %v1023_v10 = vmul.f32 2.0, %v951_v46 }
 0x14a   : > { %v907_v24 = vmul.f32 %v895_v42, %v847_v21  ;;  %v1014_v56 = vmul.f32 2.0, %v953_v36  ;;  %v990_v61 = vmul.f32 %v1399_v57, %v1715_v15 }
 0x14b   : > { %v905_v48 = vsub.f32 %v897_v23, %v903_v34  ;;  %v971_v55 = vsel %vm970_vm15, %v967_v7, %v969_v49  ;;  %v1025_v32 = vrot.slane %v1023_v10, 7 }
 0x14c   : > { %v908_v50 = vadd.f32 0.5, %v907_v24  ;;  %v974_v59 = vsel %vm972_vm0, %v973_v47, %v971_v55  ;;  %v992_v7 = vsel %vm991_vm1, %v1715_v15, %v990_v61  ;;  %v1016_v16 = vrot.slane %v1014_v56, 1 }
 0x14d   : > { %v906_v53 = vsub.f32 %v905_v48, %v845_v20  ;;  %v996_v62 = vmul.f32 %v974_v59, %v951_v46  ;;  %v995_v14 = vsel %vm993_vm2, %v994_v3, %v992_v7 }
 0x14e   : > { %v916_v58 = vsub.f32 %v908_v50, %v914_v35  ;;  %v1004_v19 = vmul.f32 %v995_v14, %v953_v36 }
 0x14f   : > { %v922_v60 = vsel %vm837_vm9, %v920_v39, %v906_v53  ;;  %v997_v8 = vadd.f32 0.5, %v996_v62 }
 0x150   : > { %v917_v4 = vsub.f32 %v916_v58, %v847_v21  ;;  %v924_v5 = vrot.slane %v922_v60, 7  ;;  %v1005_v22 = vadd.f32 0.5, %v1004_v19  ;;  %v746_v19 = vmul.f32 %v1664_v43, %v1664_v43 }
 0x151   : > { %v1002_v18 = vsub.f32 %v997_v8, %v1000_v51 }
 0x152   : > { %v926_v12 = vsel %vm838_vm10, 1.0, %v924_v5  ;;  %v931_v13 = vsel %vm838_vm10, %v929_v54, %v917_v4  ;;  %v1012_v30 = vsub.f32 %v1005_v22, %v1010_v9 }
 0x153   : > { %v933_v17 = vrot.slane %v931_v13, 1  ;;  %v1038_v20 = vmul.f32 %v1037_v52, %v926_v12  ;;  %v1081_v6 = vsub.f32 1.0, %v926_v12  ;;  %v1003_v21 = vsub.f32 %v1002_v18, %v951_v46 }
 0x154   : > { %v1013_v37 = vsub.f32 %v1012_v30, %v953_v36 }
 0x155   : > { %v935_v15 = vsel %vm837_vm9, 1.0, %v933_v17  ;;  %v1060_v26 = vadd.f32 1.0, %v1038_v20  ;;  %v1083_v28 = vrot.slane %v1081_v6, 1  ;;  %v1018_v31 = vsel %vm837_vm9, %v1016_v16, %v1003_v21 }
 0x156   : > { %v1034_v27 = vrot.slane %v935_v15, 7  ;;  %v1086_v29 = vsub.f32 1.0, %v935_v15  ;;  %v1020_v33 = vrot.slane %v1018_v31, 7  ;;  %v1027_v42 = vsel %vm837_vm9, %v1025_v32, %v1013_v37 }
 0x157   : > { %1400 = vlog2.f32 %v1060_v26  ;;  %v1085_v40 = vmul.f32 %v1083_v28, %v1664_v43  ;;  %v1029_v23 = vrot.slane %v1027_v42, 1  ;;  %v747_v20 = vmul.f32 %v746_v19, %v1664_v43 }
 0x158   : > { %v1036_v34 = vmul.f32 %v1034_v27, %v1032_v0  ;;  %v1088_v35 = vrot.slane %v1086_v29, 7  ;;  %v1022_v25 = vsel %vm837_vm9, 1.0, %v1020_v33  ;;  %v764_v0 = vrot.slane %v746_v19, 6 }
 0x159   : > { %1402 = vlog2.f32 %v1022_v25  ;;  %v1031_v44 = vsel %vm837_vm9, 1.0, %v1029_v23  ;;  %v1232_v24 = vadd.f32 -1.0, %v1022_v25  ;;  %v779_v6 = vrot.slane %v747_v20, 5 }
 0x15a   : > { %v1039_v38 = vadd.f32 1.0, %v1036_v34  ;;  %v1090_v41 = vmul.f32 %v1088_v35, %v1681_v63  ;;  %v1233_v47 = vadd.f32 -1.0, %v1031_v44 }
 0x15b   : > { %v1050_v36 = vmul.f32 0.5, %v1232_v24 }
 0x15c   : > { %1404 = vlog2.f32 %v1039_v38  ;;  %v1092_v39 = vrot.slane %v1090_v41, 1  ;;  %v1071_v52 = vmul.f32 0.5, %v1233_v47 }
 0x15d   : > { %1406 = vlog2.f32 %v1031_v44  ;;  %v1052_v55 = vrot.slane %v1050_v36, 6 }
 0x15e   : > { %v1094_v45 = vadd.f32 %v1092_v39, %v1085_v40  ;;  %v1073_v60 = vrot.slane %v1071_v52, 5 }
 0x160   : > { %v1096_v59 = vrot.slane %v1094_v45, 6 }
 0x162   : > { %v1098_v4 = vmul.f32 %v1096_v59, %v1664_v43 }
 0x164   : > { %v1401_v46 = vpop.eup %1400  ;;  %v1099_v9 = vmul.f32 0.5, %v1098_v4 }
 0x165   : > { %v1062_v63 = vmul.f32 0.6931472, %v1401_v46 }
 0x166   : > { %v1403_v48 = vpop.eup %1402  ;;  %v1105_v16 = vrot.slane %v1099_v9, 6 }
 0x167   : > { %v1044_v50 = vmul.f32 0.6931472, %v1403_v48  ;;  %v1063_v56 = vsub.f32 0.0, %v1062_v63 }
 0x169   : > { %v1405_v49 = vpop.eup %1404  ;;  %v1046_v11 = vrot.slane %v1044_v50, 6 }
 0x16a   : > { %v1041_v51 = vmul.f32 0.6931472, %v1405_v49  ;;  %v1407_v53 = vpop.eup %1406 }
 0x16b   : > { %v1065_v57 = vmul.f32 0.6931472, %v1407_v53 }
 0x16c   : > { %v1042_v54 = vsub.f32 0.0, %v1041_v51 }
 0x16d   : > { %v1067_v3 = vrot.slane %v1065_v57, 5 }
 0x16e   : > { %v1048_v58 = vsub.f32 %v1042_v54, %v1046_v11 }
 0x16f   : > { %v1069_v62 = vsub.f32 %v1063_v56, %v1067_v3 }
 0x170   : > { %v1054_v61 = vadd.f32 %v1052_v55, %v1048_v58 }
 0x171   : > { %v1075_v5 = vadd.f32 %v1073_v60, %v1069_v62 }
 0x172   : > { %v1056_v1 = vrot.slane %v1054_v61, 5 }
 0x173   : > { %v1077_v8 = vrot.slane %v1075_v5, 4 }
 0x174   : > { %v1058_v7 = vmul.f32 %v1056_v1, %v1664_v43 }
 0x175   : > { %v1079_v10 = vmul.f32 %v1077_v8, %v1664_v43 }
 0x176   : > { %v1059_v12 = vsel %vm837_vm9, 0.0, %v1058_v7 }
 0x177   : > { %v1080_v13 = vsel %vm837_vm9, 0.0, %v1079_v10 }
 0x178   : > { %v1101_v14 = vrot.slane %v1080_v13, 1 }
 0x17a   : > { %v1103_v17 = vadd.f32 %v1101_v14, %v1059_v12 }
 0x17c   : > { %v1107_v18 = vadd.f32 %v1105_v16, %v1103_v17 }
 0x1ca   : > { %v666_v15 = vpop.f32.mrf.mxu0  ;;  %v740_v21 = vpop.f32.mrf.mxu1 }
 0x1cb   : > { %v751_v22 = vmul.f32 %v1687_v2, %v666_v15  ;;  %v761_v26 = vmul.f32 0.5, %v666_v15  ;;  %v776_v27 = vmul.f32 0.16666667, %v666_v15  ;;  %v752_v25 = vmul.f32 %v1687_v2, %v740_v21 }
 0x1cc   : > { %v1309_v28 = vpop.f32.mrf.mxu0  ;;  %v1320_v29 = vpop.f32.mrf.mxu1  ;;  %v762_v38 = vmul.f32 0.5, %v740_v21  ;;  %v777_v39 = vmul.f32 0.16666667, %v740_v21 }
 0x1cd   : > { %v754_v30 = vrot.slane %v751_v22, 1  ;;  %v766_v31 = vmul.f32 %v764_v0, %v761_v26  ;;  %v781_v32 = vmul.f32 %v779_v6, %v776_v27  ;;  %v758_v42 = vrot.slane %v752_v25, 1 }
 0x1ce   : > { %v767_v23 = vmul.f32 %v764_v0, %v762_v38  ;;  %v782_v46 = vmul.f32 %v779_v6, %v777_v39 }
 0x1cf   : > { %v756_v33 = vadd.f32 %v754_v30, %v666_v15  ;;  %v769_v34 = vrot.slane %v766_v31, 2  ;;  %v784_v37 = vrot.slane %v781_v32, 3  ;;  %v760_v45 = vadd.f32 %v758_v42, %v740_v21 }
 0x1d0   : > { %v773_v24 = vrot.slane %v767_v23, 2  ;;  %v788_v48 = vrot.slane %v782_v46, 3 }
 0x1d1   : > { %v771_v35 = vadd.f32 %v769_v34, %v756_v33 }
 0x1d2   : > { %v775_v47 = vadd.f32 %v773_v24, %v760_v45 }
 0x1d3   : > { %v786_v40 = vadd.f32 %v784_v37, %v771_v35 }
 0x1d4   : > { %v790_v36 = vadd.f32 %v788_v48, %v775_v47 }
 0x1d5   : > { %v792_v41 = vsub.f32 0.0, %v786_v40 }
 0x1d6   : > { %v791_v49 = vadd.f32 1.0, %v790_v36 }
 0x1d7   : > { %v793_v44 = vmul.f32 1.442695, %v792_v41 }
 0x1d9   : > { %1408 = vpow2.f32 %v793_v44 }
 0x1e6   : > { %v1409_v2 = vpop.eup %1408 }
 0x1e7   : > { %v795_v50 = vsub.f32 %v791_v49, %v1409_v2 }
 0x1e9   : > { %v797_v63 = vrot.slane %v795_v50, 6 }
 0x1eb   : > { %v799_v51 = vmul.f32 %v797_v63, %v1664_v43 }
 0x1ed   : > { %v1109_v11 = vrot.slane %v799_v51, 7 }
 0x1ef   : > { %v1111_v52 = vadd.f32 %v1109_v11, %v1107_v18 }
 0x1f1   : > { %1112 = vst [vmem:[%s273_s9 - $0x3] sm:$0x8] %v1111_v52 }
 0x1f2   : > { %1423 = shalt.err (!%p1420_p7)
}
 0x1f3   : > { %s1424_s23 = scalar_lea.hbm %s1124_s13, 16  ;;  %s1428_s30 = scalar_lea.hbm %s1805_s5, 32 }
 0x1f4   : > { %p1425_p10 = scmp.ne.s32.totalorder %s1124_s13, %s1424_s23  ;;  %p1429_p13 = scmp.lt.s32.totalorder %s1124_s13, %s1805_s5 }
 0x1f5   : > { %p1430_p0 = scmp.lt.s32.totalorder %s1428_s30, %s1424_s23 }
 0x1f6   : > { %p1426_p11 = pnand %p1425_p10, %p1547_p6 }
 0x1f7   : > { %p1431_p1 = por %p1430_p0, %p1429_p13 }
 0x1f8   : > { %p1427_p12 = pneg %p1426_p11 }
 0x1fa   : > { %p1432_p9 = pnand %p1431_p1, %p1427_p12 }
 0x1fc   : > { %1435 = shalt.err (!%p1432_p9)
}
 0x1fd   : > { %1321 = dma.vmem_to_hbm [thread:$0]  (%p1547_p6), %s1127_s10, 16, %s1124_s13, %s1114_s14  }
 0x1fe PF: > { %s1138_s8 = sand.u32 1, %s1458_s18   ;;  %p1809_p2 = scmp.ge.s32.totalorder %s1470_s21, 2 }
 0x1ff   : > { %s1139_s9 = scalar_lea.sflag [#allocation4], %s1138_s8 }
 0x200   : > { %p1324_p3 = pnand %p1809_p2, %p1551_p8 }
 0x202   : > { %p1325_p4 = pneg %p1324_p3 }
 0x204   : > { %1453 = dma.done.wait (%p1325_p4), %s1139_s9, 16  }
 0x205   : > { %1455 = vsyncadd (%p1325_p4), %s1139_s9, 4294967280  ;;  %p15_p9 = scmp.ge.s32.totalorder %s1533_s24, 4   ;;  %s1810_s18 = smov %s1462_s19 }
 0x206   : > { %s1811_s19 = smov %s1466_s20  ;;  %s1812_s20 = smov %s1545_s27 }
 0x207   : > { %s1813_s21 = smov %s1533_s24  ;;  %17 = sbr.rel (!%p15_p9) target bundleno = 3 (0x3), region = 121 }
 0x20c   :  { %1143 = vsyncpa [#allocation4], 1 }
 0x20d   :  { %1145 = vsyncpa [#allocation4 + $0x1], 1 }

</bundles_post_ra>
